<compile_context>
chip_gen: v7x
topology: tpu7x:2x2x1
jax: 0.10.0
libtpu: 0.0.40
codegen_flags: <defaults>
</compile_context>

<pallas_src>
import jax
import jax.numpy as jnp
import numpy as np
from jax.experimental import pallas as pl
from jax.experimental.pallas import tpu as pltpu

NEG_SLOPE = 0.01
BN_EPS = 1e-5
HIDDEN_PAD = 128   # lane-pad hidden dims to one full vreg width
OUT_PAD = 128      # lane-dense output slab (rounded up to a multiple of 128)


def _linear(x, w_ref, b_ref):
    return jnp.dot(x, w_ref[...], preferred_element_type=jnp.float32) + b_ref[...]


def _leaky_relu(x):
    return jnp.where(x >= 0, x, NEG_SLOPE * x)


def _bn_train(x, g_ref, b_ref, mean_row):
    # Training-mode BatchNorm1d: per-feature batch mean / biased variance.
    # Both batch sums go through the MXU as independent [1,B]@[B,N] matmuls
    # (no serial mean -> var dependency).  The E[x^2]-mean^2 cancellation is
    # benign at these O(1) activation scales (verified against the reference).
    mean = jnp.dot(mean_row, x, preferred_element_type=jnp.float32)       # [1, N]
    ex2 = jnp.dot(mean_row, x * x, preferred_element_type=jnp.float32)    # [1, N]
    var = ex2 - mean * mean
    scale = jax.lax.rsqrt(var + BN_EPS) * g_ref[...]                      # [1, N]
    shift = b_ref[...] - mean * scale                                     # [1, N]
    return x * scale + shift


def dueling_dqn_kernel(
    x_ref,
    w1_ref, b1_ref, g1_ref, bt1_ref,
    w2_ref, b2_ref, g2_ref, bt2_ref,
    wva_ref, bva_ref, gva_ref, btva_ref,
    whead_ref, bhead_ref,
    q_ref,
):
    x = x_ref[...].astype(jnp.float32)
    batch = x.shape[0]
    mean_row = jnp.full((1, batch), 1.0 / batch, jnp.float32)  # constant, hoisted

    # feature layer: Linear -> LeakyReLU -> BN -> Linear -> LeakyReLU -> BN
    h = _bn_train(_leaky_relu(_linear(x, w1_ref, b1_ref)), g1_ref, bt1_ref, mean_row)
    feats = _bn_train(_leaky_relu(_linear(h, w2_ref, b2_ref)), g2_ref, bt2_ref,
                      mean_row)

    # fused value|advantage hidden layer: one [Hp, 2*Hp] matmul, BN on concat
    va = _bn_train(_leaky_relu(_linear(feats, wva_ref, bva_ref)), gva_ref, btva_ref,
                   mean_row)

    # head with the dueling combine pre-folded into the weights:
    # lanes 0..A-1 hold q = value + adv - mean(adv); lanes >= A are exactly 0.
    q_ref[...] = _linear(va, whead_ref, bhead_ref).astype(q_ref.dtype)


def prepare_kernel_params(params, hidden_pad=HIDDEN_PAD, out_pad=OUT_PAD):
    """One-time fusion + zero-padding + dueling-combine fold (exact)."""
    (w1, b1, g1, bt1, w2, b2, g2, bt2,
     wv1, bv1, gv, btv, wv2, bv2,
     wa1, ba1, ga, bta, wa2, ba2) = params

    in_dim, hid = w1.shape
    adv_dim = wa2.shape[1]
    hp = max(hidden_pad, hid)
    op = max(out_pad, ((adv_dim + 1 + 127) // 128) * 128)  # keep the store lane-dense

    def pad_w(w, rows, cols):
        return jnp.zeros((rows, cols), jnp.float32).at[: w.shape[0], : w.shape[1]].set(w)

    def pad_row(v, cols, fill=0.0):
        return jnp.full((1, cols), fill, jnp.float32).at[:, : v.shape[1]].set(v)

    # feature layer (hidden padded to hp; padded lanes are zero -> stay zero)
    w1p, b1p = pad_w(w1, in_dim, hp), pad_row(b1, hp)
    g1p, bt1p = pad_row(g1, hp, 1.0), pad_row(bt1, hp)
    w2p, b2p = pad_w(w2, hp, hp), pad_row(b2, hp)
    g2p, bt2p = pad_row(g2, hp, 1.0), pad_row(bt2, hp)

    # fused value|advantage hidden layer: [hp, 2*hp]
    wvap = (jnp.zeros((hp, 2 * hp), jnp.float32)
            .at[:hid, :hid].set(wv1)
            .at[:hid, hp:hp + hid].set(wa1))
    bvap = (jnp.zeros((1, 2 * hp), jnp.float32)
            .at[:, :hid].set(bv1)
            .at[:, hp:hp + hid].set(ba1))
    gvap = (jnp.ones((1, 2 * hp), jnp.float32)
            .at[:, :hid].set(gv)
            .at[:, hp:hp + hid].set(ga))
    btvap = (jnp.zeros((1, 2 * hp), jnp.float32)
             .at[:, :hid].set(btv)
             .at[:, hp:hp + hid].set(bta))

    # block-diagonal head: adv logits in cols 0..A-1 (advantage half of va),
    # scalar value in col A (value half of va), remaining lanes zero.
    whead = (jnp.zeros((2 * hp, op), jnp.float32)
             .at[hp:hp + hid, :adv_dim].set(wa2)
             .at[:hid, adv_dim:adv_dim + 1].set(wv2))
    bhead = (jnp.zeros((1, op), jnp.float32)
             .at[:, :adv_dim].set(ba2)
             .at[:, adv_dim:adv_dim + 1].set(bv2))

    # Fold the dueling combine (value + adv - mean(adv)) into the head:
    #   combine[j, j] = 1 - 1/A,   combine[k, j] = -1/A  (k != j, k < A),
    #   combine[A, j] = 1 for j < A; columns >= A are all zero.
    combine = (jnp.zeros((op, op), jnp.float32)
               .at[:adv_dim, :adv_dim].set(
                   jnp.eye(adv_dim, dtype=jnp.float32) - 1.0 / adv_dim)
               .at[adv_dim, :adv_dim].set(1.0))
    wheadp = whead @ combine
    bheadp = bhead @ combine

    kparams = (w1p, b1p, g1p, bt1p,
               w2p, b2p, g2p, bt2p,
               wvap, bvap, gvap, btvap,
               wheadp, bheadp)
    return kparams, adv_dim, op


def dueling_dqn_forward(state, kparams, out_pad):
    """state: [B, input_dim] f32.  Returns the padded [B, out_pad] Q slab:
    lanes 0..A-1 hold the Q-values, remaining lanes are exactly zero.  The
    logical slice/mask is left to the consumer (avoids an extra tiny XLA copy
    kernel with masked 8-lane stores)."""
    batch, in_dim = state.shape
    hp = kparams[4].shape[0]  # padded hidden dim (w2p is [hp, hp])

    flops = (2 * batch * (in_dim * hp + hp * hp + hp * 2 * hp + 2 * hp * out_pad)
             + 2 * 2 * batch * (hp + hp + 2 * hp))       # BN-stat matmuls
    bytes_accessed = 4 * (int(state.size) + batch * out_pad
                          + sum(int(p.size) for p in kparams))
    n_inputs = 1 + len(kparams)

    return pl.pallas_call(
        dueling_dqn_kernel,
        out_shape=jax.ShapeDtypeStruct((batch, out_pad), jnp.float32),
        in_specs=[pl.BlockSpec(memory_space=pltpu.MemorySpace.VMEM)] * n_inputs,
        out_specs=pl.BlockSpec(memory_space=pltpu.MemorySpace.VMEM),
        cost_estimate=pl.CostEstimate(
            flops=flops, transcendentals=4 * hp, bytes_accessed=bytes_accessed),
    )(state, *kparams)


def init_params(key, input_dim, hidden_dim, output_dim):
    """Deterministic synthetic parameters (shapes match the nn.Module)."""
    def lin(key, fan_in, fan_out):
        kw, kb = jax.random.split(key)
        bound = 1.0 / np.sqrt(fan_in)
        w = jax.random.uniform(kw, (fan_in, fan_out), jnp.float32, -bound, bound)
        b = jax.random.uniform(kb, (1, fan_out), jnp.float32, -bound, bound)
        return w, b

    def bn(key, dim):
        kg, kb = jax.random.split(key)
        g = 1.0 + 0.1 * jax.random.normal(kg, (1, dim), jnp.float32)
        b = 0.1 * jax.random.normal(kb, (1, dim), jnp.float32)
        return g, b

    keys = jax.random.split(key, 10)
    w1, b1 = lin(keys[0], input_dim, hidden_dim)
    g1, bt1 = bn(keys[1], hidden_dim)
    w2, b2 = lin(keys[2], hidden_dim, hidden_dim)
    g2, bt2 = bn(keys[3], hidden_dim)
    wv1, bv1 = lin(keys[4], hidden_dim, hidden_dim)
    gv, btv = bn(keys[5], hidden_dim)
    wv2, bv2 = lin(keys[6], hidden_dim, 1)
    wa1, ba1 = lin(keys[7], hidden_dim, hidden_dim)
    ga, bta = bn(keys[8], hidden_dim)
    wa2, ba2 = lin(keys[9], hidden_dim, output_dim)
    return (w1, b1, g1, bt1,
            w2, b2, g2, bt2,
            wv1, bv1, gv, btv,
            wv2, bv2,
            wa1, ba1, ga, bta,
            wa2, ba2)


def reference_forward(state, params):
    """Pure-JAX reference mirroring the PyTorch forward (training-mode BN)."""
    (w1, b1, g1, bt1, w2, b2, g2, bt2,
     wv1, bv1, gv, btv, wv2, bv2,
     wa1, ba1, ga, bta, wa2, ba2) = params

    def lrelu(x):
        return jnp.where(x >= 0, x, NEG_SLOPE * x)

    def bn(x, g, b):
        m = jnp.mean(x, axis=0, keepdims=True)
        v = jnp.mean((x - m) ** 2, axis=0, keepdims=True)
        return (x - m) / jnp.sqrt(v + BN_EPS) * g + b

    h = bn(lrelu(state @ w1 + b1), g1, bt1)
    feats = bn(lrelu(h @ w2 + b2), g2, bt2)
    vh = bn(lrelu(feats @ wv1 + bv1), gv, btv)
    values = vh @ wv2 + bv2
    ah = bn(lrelu(feats @ wa1 + ba1), ga, bta)
    adv = ah @ wa2 + ba2
    return values + (adv - jnp.mean(adv, axis=1, keepdims=True))


if __name__ == "__main__":
    INPUT_DIM, HIDDEN_DIM, OUTPUT_DIM = 16, 32, 8
    BATCH = 128  # multiple of 8 sublanes; amortizes launch + MXU latency

    key = jax.random.PRNGKey(0)
    k_x, k_p = jax.random.split(key)
    state = jax.random.normal(k_x, (BATCH, INPUT_DIM), jnp.float32)
    params = init_params(k_p, INPUT_DIM, HIDDEN_DIM, OUTPUT_DIM)

    # One-time fusion / lane-padding / dueling-combine fold of the parameters.
    kparams, adv_dim, out_pad = prepare_kernel_params(params)

    q_pad = dueling_dqn_forward(state, kparams, out_pad)
    q_pad = jax.block_until_ready(q_pad)

    q_pad_np = np.asarray(q_pad)
    q = q_pad_np[:, :adv_dim]               # host-side slice; no extra TPU kernel
    q_ref = np.asarray(reference_forward(state, params))
    np.testing.assert_allclose(q, q_ref, rtol=1e-4, atol=1e-4)

    # Padding lanes are (exactly) zero thanks to the folded head weights.
    np.testing.assert_allclose(q_pad_np[:, adv_dim:], 0.0, atol=1e-6)

    print("KERNEL_OK")
</pallas_src>

<mosaic_0001>
module attributes {stable_mosaic.version = 11 : i64} {
  func.func @dueling_dqn_kernel(%arg0: memref<128x16xf32, #tpu.memory_space<vmem>>, %arg1: memref<16x128xf32, #tpu.memory_space<vmem>>, %arg2: memref<1x128xf32, #tpu.memory_space<vmem>>, %arg3: memref<1x128xf32, #tpu.memory_space<vmem>>, %arg4: memref<1x128xf32, #tpu.memory_space<vmem>>, %arg5: memref<128x128xf32, #tpu.memory_space<vmem>>, %arg6: memref<1x128xf32, #tpu.memory_space<vmem>>, %arg7: memref<1x128xf32, #tpu.memory_space<vmem>>, %arg8: memref<1x128xf32, #tpu.memory_space<vmem>>, %arg9: memref<128x256xf32, #tpu.memory_space<vmem>>, %arg10: memref<1x256xf32, #tpu.memory_space<vmem>>, %arg11: memref<1x256xf32, #tpu.memory_space<vmem>>, %arg12: memref<1x256xf32, #tpu.memory_space<vmem>>, %arg13: memref<256x128xf32, #tpu.memory_space<vmem>>, %arg14: memref<1x128xf32, #tpu.memory_space<vmem>>, %arg15: memref<128x128xf32, #tpu.memory_space<vmem>>) attributes {dimension_semantics = [], scalar_prefetch = 0 : i64, scratch_operands = 0 : i64, tpu.core_type = #tpu.core_type<tc>} {
    %c0 = arith.constant 0 : index
    %c0_0 = arith.constant 0 : index
    %0 = vector.load %arg0[%c0, %c0_0] : memref<128x16xf32, #tpu.memory_space<vmem>>, vector<128x16xf32>
    %cst = arith.constant 7.812500e-03 : f32
    %1 = vector.broadcast %cst : f32 to vector<1x128xf32>
    %c0_1 = arith.constant 0 : index
    %c0_2 = arith.constant 0 : index
    %2 = vector.load %arg1[%c0_1, %c0_2] : memref<16x128xf32, #tpu.memory_space<vmem>>, vector<16x128xf32>
    %cst_3 = arith.constant dense<0.000000e+00> : vector<128x128xf32>
    %3 = tpu.matmul %0, %2, %cst_3 {dimension_numbers = #tpu.dot_dimension_numbers<[1], [0], [0], [1], [0, 0, 1, 1], [], []>} : vector<128x16xf32>, vector<16x128xf32>, vector<128x128xf32> -> vector<128x128xf32>
    %c0_4 = arith.constant 0 : index
    %c0_5 = arith.constant 0 : index
    %4 = vector.load %arg2[%c0_4, %c0_5] : memref<1x128xf32, #tpu.memory_space<vmem>>, vector<1x128xf32>
    %5 = vector.broadcast %4 : vector<1x128xf32> to vector<128x128xf32>
    %6 = arith.addf %3, %5 : vector<128x128xf32>
    %cst_6 = arith.constant 0.000000e+00 : f32
    %7 = vector.broadcast %cst_6 : f32 to vector<128x128xf32>
    %8 = arith.cmpf oge, %6, %7 : vector<128x128xf32>
    %cst_7 = arith.constant 0.00999999977 : f32
    %9 = vector.broadcast %cst_7 : f32 to vector<128x128xf32>
    %10 = arith.mulf %9, %6 : vector<128x128xf32>
    %11 = arith.select %8, %6, %10 : vector<128x128xi1>, vector<128x128xf32>
    %cst_8 = arith.constant dense<0.000000e+00> : vector<1x128xf32>
    %12 = tpu.matmul %1, %11, %cst_8 {dimension_numbers = #tpu.dot_dimension_numbers<[1], [0], [0], [1], [0, 0, 1, 1], [], []>} : vector<1x128xf32>, vector<128x128xf32>, vector<1x128xf32> -> vector<1x128xf32>
    %13 = arith.mulf %11, %11 : vector<128x128xf32>
    %cst_9 = arith.constant dense<0.000000e+00> : vector<1x128xf32>
    %14 = tpu.matmul %1, %13, %cst_9 {dimension_numbers = #tpu.dot_dimension_numbers<[1], [0], [0], [1], [0, 0, 1, 1], [], []>} : vector<1x128xf32>, vector<128x128xf32>, vector<1x128xf32> -> vector<1x128xf32>
    %15 = arith.mulf %12, %12 : vector<1x128xf32>
    %16 = arith.subf %14, %15 : vector<1x128xf32>
    %cst_10 = arith.constant 9.99999974E-6 : f32
    %17 = vector.broadcast %cst_10 : f32 to vector<1x128xf32>
    %18 = arith.addf %16, %17 : vector<1x128xf32>
    %19 = math.rsqrt %18 : vector<1x128xf32>
    %c0_11 = arith.constant 0 : index
    %c0_12 = arith.constant 0 : index
    %20 = vector.load %arg3[%c0_11, %c0_12] : memref<1x128xf32, #tpu.memory_space<vmem>>, vector<1x128xf32>
    %21 = arith.mulf %19, %20 : vector<1x128xf32>
    %c0_13 = arith.constant 0 : index
    %c0_14 = arith.constant 0 : index
    %22 = vector.load %arg4[%c0_13, %c0_14] : memref<1x128xf32, #tpu.memory_space<vmem>>, vector<1x128xf32>
    %23 = arith.mulf %12, %21 : vector<1x128xf32>
    %24 = arith.subf %22, %23 : vector<1x128xf32>
    %25 = vector.broadcast %21 : vector<1x128xf32> to vector<128x128xf32>
    %26 = arith.mulf %11, %25 : vector<128x128xf32>
    %27 = vector.broadcast %24 : vector<1x128xf32> to vector<128x128xf32>
    %28 = arith.addf %26, %27 : vector<128x128xf32>
    %c0_15 = arith.constant 0 : index
    %c0_16 = arith.constant 0 : index
    %29 = vector.load %arg5[%c0_15, %c0_16] : memref<128x128xf32, #tpu.memory_space<vmem>>, vector<128x128xf32>
    %cst_17 = arith.constant dense<0.000000e+00> : vector<128x128xf32>
    %30 = tpu.matmul %28, %29, %cst_17 {dimension_numbers = #tpu.dot_dimension_numbers<[1], [0], [0], [1], [0, 0, 1, 1], [], []>} : vector<128x128xf32>, vector<128x128xf32>, vector<128x128xf32> -> vector<128x128xf32>
    %c0_18 = arith.constant 0 : index
    %c0_19 = arith.constant 0 : index
    %31 = vector.load %arg6[%c0_18, %c0_19] : memref<1x128xf32, #tpu.memory_space<vmem>>, vector<1x128xf32>
    %32 = vector.broadcast %31 : vector<1x128xf32> to vector<128x128xf32>
    %33 = arith.addf %30, %32 : vector<128x128xf32>
    %cst_20 = arith.constant 0.000000e+00 : f32
    %34 = vector.broadcast %cst_20 : f32 to vector<128x128xf32>
    %35 = arith.cmpf oge, %33, %34 : vector<128x128xf32>
    %cst_21 = arith.constant 0.00999999977 : f32
    %36 = vector.broadcast %cst_21 : f32 to vector<128x128xf32>
    %37 = arith.mulf %36, %33 : vector<128x128xf32>
    %38 = arith.select %35, %33, %37 : vector<128x128xi1>, vector<128x128xf32>
    %cst_22 = arith.constant dense<0.000000e+00> : vector<1x128xf32>
    %39 = tpu.matmul %1, %38, %cst_22 {dimension_numbers = #tpu.dot_dimension_numbers<[1], [0], [0], [1], [0, 0, 1, 1], [], []>} : vector<1x128xf32>, vector<128x128xf32>, vector<1x128xf32> -> vector<1x128xf32>
    %40 = arith.mulf %38, %38 : vector<128x128xf32>
    %cst_23 = arith.constant dense<0.000000e+00> : vector<1x128xf32>
    %41 = tpu.matmul %1, %40, %cst_23 {dimension_numbers = #tpu.dot_dimension_numbers<[1], [0], [0], [1], [0, 0, 1, 1], [], []>} : vector<1x128xf32>, vector<128x128xf32>, vector<1x128xf32> -> vector<1x128xf32>
    %42 = arith.mulf %39, %39 : vector<1x128xf32>
    %43 = arith.subf %41, %42 : vector<1x128xf32>
    %cst_24 = arith.constant 9.99999974E-6 : f32
    %44 = vector.broadcast %cst_24 : f32 to vector<1x128xf32>
    %45 = arith.addf %43, %44 : vector<1x128xf32>
    %46 = math.rsqrt %45 : vector<1x128xf32>
    %c0_25 = arith.constant 0 : index
    %c0_26 = arith.constant 0 : index
    %47 = vector.load %arg7[%c0_25, %c0_26] : memref<1x128xf32, #tpu.memory_space<vmem>>, vector<1x128xf32>
    %48 = arith.mulf %46, %47 : vector<1x128xf32>
    %c0_27 = arith.constant 0 : index
    %c0_28 = arith.constant 0 : index
    %49 = vector.load %arg8[%c0_27, %c0_28] : memref<1x128xf32, #tpu.memory_space<vmem>>, vector<1x128xf32>
    %50 = arith.mulf %39, %48 : vector<1x128xf32>
    %51 = arith.subf %49, %50 : vector<1x128xf32>
    %52 = vector.broadcast %48 : vector<1x128xf32> to vector<128x128xf32>
    %53 = arith.mulf %38, %52 : vector<128x128xf32>
    %54 = vector.broadcast %51 : vector<1x128xf32> to vector<128x128xf32>
    %55 = arith.addf %53, %54 : vector<128x128xf32>
    %c0_29 = arith.constant 0 : index
    %c0_30 = arith.constant 0 : index
    %56 = vector.load %arg9[%c0_29, %c0_30] : memref<128x256xf32, #tpu.memory_space<vmem>>, vector<128x256xf32>
    %cst_31 = arith.constant dense<0.000000e+00> : vector<128x256xf32>
    %57 = tpu.matmul %55, %56, %cst_31 {dimension_numbers = #tpu.dot_dimension_numbers<[1], [0], [0], [1], [0, 0, 1, 1], [], []>} : vector<128x128xf32>, vector<128x256xf32>, vector<128x256xf32> -> vector<128x256xf32>
    %c0_32 = arith.constant 0 : index
    %c0_33 = arith.constant 0 : index
    %58 = vector.load %arg10[%c0_32, %c0_33] : memref<1x256xf32, #tpu.memory_space<vmem>>, vector<1x256xf32>
    %59 = vector.broadcast %58 : vector<1x256xf32> to vector<128x256xf32>
    %60 = arith.addf %57, %59 : vector<128x256xf32>
    %cst_34 = arith.constant 0.000000e+00 : f32
    %61 = vector.broadcast %cst_34 : f32 to vector<128x256xf32>
    %62 = arith.cmpf oge, %60, %61 : vector<128x256xf32>
    %cst_35 = arith.constant 0.00999999977 : f32
    %63 = vector.broadcast %cst_35 : f32 to vector<128x256xf32>
    %64 = arith.mulf %63, %60 : vector<128x256xf32>
    %65 = arith.select %62, %60, %64 : vector<128x256xi1>, vector<128x256xf32>
    %cst_36 = arith.constant dense<0.000000e+00> : vector<1x256xf32>
    %66 = tpu.matmul %1, %65, %cst_36 {dimension_numbers = #tpu.dot_dimension_numbers<[1], [0], [0], [1], [0, 0, 1, 1], [], []>} : vector<1x128xf32>, vector<128x256xf32>, vector<1x256xf32> -> vector<1x256xf32>
    %67 = arith.mulf %65, %65 : vector<128x256xf32>
    %cst_37 = arith.constant dense<0.000000e+00> : vector<1x256xf32>
    %68 = tpu.matmul %1, %67, %cst_37 {dimension_numbers = #tpu.dot_dimension_numbers<[1], [0], [0], [1], [0, 0, 1, 1], [], []>} : vector<1x128xf32>, vector<128x256xf32>, vector<1x256xf32> -> vector<1x256xf32>
    %69 = arith.mulf %66, %66 : vector<1x256xf32>
    %70 = arith.subf %68, %69 : vector<1x256xf32>
    %cst_38 = arith.constant 9.99999974E-6 : f32
    %71 = vector.broadcast %cst_38 : f32 to vector<1x256xf32>
    %72 = arith.addf %70, %71 : vector<1x256xf32>
    %73 = math.rsqrt %72 : vector<1x256xf32>
    %c0_39 = arith.constant 0 : index
    %c0_40 = arith.constant 0 : index
    %74 = vector.load %arg11[%c0_39, %c0_40] : memref<1x256xf32, #tpu.memory_space<vmem>>, vector<1x256xf32>
    %75 = arith.mulf %73, %74 : vector<1x256xf32>
    %c0_41 = arith.constant 0 : index
    %c0_42 = arith.constant 0 : index
    %76 = vector.load %arg12[%c0_41, %c0_42] : memref<1x256xf32, #tpu.memory_space<vmem>>, vector<1x256xf32>
    %77 = arith.mulf %66, %75 : vector<1x256xf32>
    %78 = arith.subf %76, %77 : vector<1x256xf32>
    %79 = vector.broadcast %75 : vector<1x256xf32> to vector<128x256xf32>
    %80 = arith.mulf %65, %79 : vector<128x256xf32>
    %81 = vector.broadcast %78 : vector<1x256xf32> to vector<128x256xf32>
    %82 = arith.addf %80, %81 : vector<128x256xf32>
    %c0_43 = arith.constant 0 : index
    %c0_44 = arith.constant 0 : index
    %83 = vector.load %arg13[%c0_43, %c0_44] : memref<256x128xf32, #tpu.memory_space<vmem>>, vector<256x128xf32>
    %cst_45 = arith.constant dense<0.000000e+00> : vector<128x128xf32>
    %84 = tpu.matmul %82, %83, %cst_45 {dimension_numbers = #tpu.dot_dimension_numbers<[1], [0], [0], [1], [0, 0, 1, 1], [], []>} : vector<128x256xf32>, vector<256x128xf32>, vector<128x128xf32> -> vector<128x128xf32>
    %c0_46 = arith.constant 0 : index
    %c0_47 = arith.constant 0 : index
    %85 = vector.load %arg14[%c0_46, %c0_47] : memref<1x128xf32, #tpu.memory_space<vmem>>, vector<1x128xf32>
    %86 = vector.broadcast %85 : vector<1x128xf32> to vector<128x128xf32>
    %87 = arith.addf %84, %86 : vector<128x128xf32>
    %c0_48 = arith.constant 0 : index
    %c0_49 = arith.constant 0 : index
    %88 = vector.load %arg15[%c0_48, %c0_49] : memref<128x128xf32, #tpu.memory_space<vmem>>, vector<128x128xf32>
    tpu.vector_store %arg15[%c0_48, %c0_49], %87 {strides = array<i32>} : memref<128x128xf32, #tpu.memory_space<vmem>>, vector<128x128xf32>,
    return
  }
}

</mosaic_0001>

<bundles_post_ra>
// kernel: tpu_custom_call.1
= control target key start
LH: loop header
LB: loop body
LE: loop exit
PB: predicated region body
PF: predicated region fallthrough
CT: control target
= control target key end

     0   :  { %20 = vsyncpa [#allocation3], 0  ;;  %s3430_s0 = inlined_call_operand.vmem [shape: f32[128,16], index: 0, kind: input, shape index: {}]   ;;  %s3431_s1 = inlined_call_operand.vmem [shape: f32[16,128], index: 1, kind: input, shape index: {}]   ;;  %s3432_s2 = inlined_call_operand.vmem [shape: f32[1,128], index: 2, kind: input, shape index: {}]   ;;  %s3433_s3 = inlined_call_operand.vmem [shape: f32[1,128], index: 3, kind: input, shape index: {}]   ;;  %s3434_s4 = inlined_call_operand.vmem [shape: f32[1,128], index: 4, kind: input, shape index: {}]   ;;  %s3435_s5 = inlined_call_operand.vmem [shape: f32[128,128], index: 5, kind: input, shape index: {}]   ;;  %s3436_s6 = inlined_call_operand.vmem [shape: f32[1,128], index: 6, kind: input, shape index: {}]   ;;  %s3437_s7 = inlined_call_operand.vmem [shape: f32[1,128], index: 7, kind: input, shape index: {}]   ;;  %s3438_s8 = inlined_call_operand.vmem [shape: f32[1,128], index: 8, kind: input, shape index: {}]   ;;  %s3439_s9 = inlined_call_operand.hbm [shape: f32[128,256], index: 9, kind: input, shape index: {}]   ;;  %s3440_s10 = inlined_call_operand.vmem [shape: f32[1,256], index: 10, kind: input, shape index: {}]   ;;  %s3441_s11 = inlined_call_operand.vmem [shape: f32[1,256], index: 11, kind: input, shape index: {}]   ;;  %s3442_s12 = inlined_call_operand.vmem [shape: f32[1,256], index: 12, kind: input, shape index: {}]   ;;  %s3443_s13 = inlined_call_operand.hbm [shape: f32[256,128], index: 13, kind: input, shape index: {}]   ;;  %s3444_s14 = inlined_call_operand.vmem [shape: f32[1,128], index: 14, kind: input, shape index: {}]   ;;  %s3445_s15 = inlined_call_operand.hbm [shape: f32[128,128], index: 15, kind: output, shape index: {}]  }
   0x1   :  { %21 = vsyncpa [#allocation6], 0 }
   0x2   :  { %22 = vsyncpa [#allocation4], 0  ;;  %s2589_s18 = smov [#allocation2]   ;;  %s2517_s22 = scalar_lea.hbm %s3439_s9, 4096 }
   0x3   :  { %s46_s19 = sshll.u32 %s2589_s18, 4  ;;  %p2518_p0 = scmp.ne.s32.totalorder %s3439_s9, %s2517_s22  ;;  %s47_s19 = int_to_ptr.vmem [resolvable:$true] %s46_s19 }
   0x4   :  { %p2521_p1 = scmp.lt.u32.totalorder %s2517_s22, %s3439_s9 }
   0x6   :  { %p2523_p2 = pnand %p2521_p1, %p2518_p0 }
   0x8   :  { %2526 = shalt.err (!%p2523_p2)
}
   0x9   :  { %s2527_s27 = scalar_lea.vmem %s47_s19, 4096  ;;  %p2532_p4 = scmp.lt.s32.totalorder %s47_s19, %s47_s19 }
   0xa   :  { %p2528_p3 = scmp.ne.s32.totalorder %s47_s19, %s2527_s27  ;;  %p2533_p5 = scmp.lt.s32.totalorder %s2527_s27, %s2527_s27 }
   0xc   :  { %p2534_p6 = por %p2533_p5, %p2532_p4 }
   0xe   :  { %p2535_p7 = pnand %p2534_p6, %p2528_p3 }
  0x10   :  { %2538 = shalt.err (!%p2535_p7)
}
  0x11   :  { %s2590_s28 = smov 256   ;;  %s2591_s29 = smov 16  }
  0x12   :  { %52 = dma.hbm_to_vmem [thread:$0]  %s3439_s9, 4096, %s47_s19, [#allocation3], %s2590_s28, %s2590_s28, %s2591_s29  }
  0x13   :  { %s2592_s17 = smov [#allocation5]   ;;  %s2539_s22 = scalar_lea.hbm %s3443_s13, 4096 }
  0x14   :  { %s64_s18 = sshll.u32 %s2592_s17, 4  ;;  %p2540_p8 = scmp.ne.s32.totalorder %s3443_s13, %s2539_s22  ;;  %s65_s18 = int_to_ptr.vmem [resolvable:$true] %s64_s18 }
  0x15   :  { %p2543_p9 = scmp.lt.u32.totalorder %s2539_s22, %s3443_s13 }
  0x17   :  { %p2545_p10 = pnand %p2543_p9, %p2540_p8 }
  0x19   :  { %2548 = shalt.err (!%p2545_p10)
}
  0x1a   :  { %s2549_s27 = scalar_lea.vmem %s65_s18, 4096  ;;  %p2554_p12 = scmp.lt.s32.totalorder %s65_s18, %s65_s18 }
  0x1b   :  { %p2550_p11 = scmp.ne.s32.totalorder %s65_s18, %s2549_s27  ;;  %p2555_p13 = scmp.lt.s32.totalorder %s2549_s27, %s2549_s27 }
  0x1d   :  { %p2556_p0 = por %p2555_p13, %p2554_p12 }
  0x1f   :  { %p2557_p1 = pnand %p2556_p0, %p2550_p11 }
  0x21   :  { %2560 = shalt.err (!%p2557_p1)
}
  0x22   :  { %s2593_s9 = smov 128   ;;  %s2594_s19 = smov 8  }
  0x23   :  { %70 = dma.hbm_to_vmem [thread:$0]  %s3443_s13, 4096, %s65_s18, [#allocation6], %s2593_s9, %s2593_s9, %s2594_s19  }
  0x24   :  { %2583 = dma.done.wait [#allocation3], 4096  }
  0x25   :  { %2584 = vsyncadd [#allocation3], 4294963200 }
  0x26   :  { %2585 = dma.done.wait [#allocation6], 4096  }
  0x27   :  { %2586 = vsyncadd [#allocation6], 4294963200  ;;  %vm104_vm0 = vcmask 130048   ;;  %v95_v0 = vld [vmem:[%s3431_s1] sm:$0xff]  ;;  %v96_v1 = vld [vmem:[%s3431_s1 + $0x8] sm:$0xff]  ;;  %v2595_v19 = vmov 0.0|0.0  }
  0x28   :  { %v79_v2 = vld [vmem:[%s3430_s0] sm:$0xff]  ;;  %v2237_v3 = vpack.c.bf16 %v96_v1, %v95_v0  ;;  %v80_v4 = vld [vmem:[%s3430_s0 + $0x8] sm:$0xff]  ;;  %v81_v5 = vld [vmem:[%s3430_s0 + $0x10] sm:$0xff]  ;;  %2241 = vmatprep.subr.bf16.mxu1 %v2595_v19  ;;  %vm2596_vm1 = vmmov 0   ;;  %v2597_v20 = vmov 0.0  }
  0x29   :  { %2017 = vmatprep.mubr.msk.f32.mxu0 %vm104_vm0, %v79_v2  ;;  %v82_v6 = vld [vmem:[%s3430_s0 + $0x18] sm:$0xff]  ;;  %v83_v7 = vld [vmem:[%s3430_s0 + $0x20] sm:$0xff]  ;;  %v84_v8 = vld [vmem:[%s3430_s0 + $0x28] sm:$0xff]  ;;  %2073 = vmatprep.mubr.msk.f32.mxu1 %vm2596_vm1, %v2597_v20 }
  0x2a   :  { %2238 = vmatprep.subr.bf16.mxu0 %v2237_v3  ;;  %v85_v9 = vld [vmem:[%s3430_s0 + $0x30] sm:$0xff]  ;;  %v86_v10 = vld [vmem:[%s3430_s0 + $0x38] sm:$0xff]  ;;  %v87_v11 = vld [vmem:[%s3430_s0 + $0x40] sm:$0xff] }
  0x2b   :  { %2240 = vmatpush3.bf16.msra.mxu0 %v2237_v3  ;;  %v88_v12 = vld [vmem:[%s3430_s0 + $0x48] sm:$0xff]  ;;  %v89_v13 = vld [vmem:[%s3430_s0 + $0x50] sm:$0xff]  ;;  %v90_v14 = vld [vmem:[%s3430_s0 + $0x58] sm:$0xff] }
  0x2c   :  { %v91_v15 = vld [vmem:[%s3430_s0 + $0x60] sm:$0xff]  ;;  %v92_v16 = vld [vmem:[%s3430_s0 + $0x68] sm:$0xff]  ;;  %v93_v17 = vld [vmem:[%s3430_s0 + $0x70] sm:$0xff]  ;;  %2321 = vmatprep.subr.bf16.mxu0 %v2595_v19 }
  0x2d   :  { %v94_v18 = vld [vmem:[%s3430_s0 + $0x78] sm:$0xff]  ;;  %v2787_v21 = vld [vmem:[%s3432_s2] ss:$0 sm:$0xff] }
  0x2e   :  { %2018 = vmatmul.mubr.msk.f32.vlgmr.msra.gmra.mrb[0].mxu0 %vm104_vm0, %v80_v4 }
  0x2f   :  { %2020 = vmatprep.mubr.msk.f32.mxu0 %vm104_vm0, %v81_v5 }
  0x32   :  { %2021 = vmatmul.mubr.msk.f32.gmra.mrb[2].mxu0 %vm104_vm0, %v82_v6 }
  0x33   :  { %2023 = vmatprep.mubr.msk.f32.mxu0 %vm104_vm0, %v83_v7 }
  0x36   :  { %2024 = vmatmul.mubr.msk.f32.gmra.mrb[4].mxu0 %vm104_vm0, %v84_v8 }
  0x37   :  { %2026 = vmatprep.mubr.msk.f32.mxu0 %vm104_vm0, %v85_v9 }
  0x3a   :  { %2027 = vmatmul.mubr.msk.f32.gmra.mrb[6].mxu0 %vm104_vm0, %v86_v10 }
  0x3b   :  { %2029 = vmatprep.mubr.msk.f32.mxu0 %vm104_vm0, %v87_v11 }
  0x3e   :  { %2030 = vmatmul.mubr.msk.f32.gmra.mrb[8].mxu0 %vm104_vm0, %v88_v12 }
  0x3f   :  { %2032 = vmatprep.mubr.msk.f32.mxu0 %vm104_vm0, %v89_v13 }
  0x42   :  { %2033 = vmatmul.mubr.msk.f32.gmra.mrb[10].mxu0 %vm104_vm0, %v90_v14 }
  0x43   :  { %2035 = vmatprep.mubr.msk.f32.mxu0 %vm104_vm0, %v91_v15 }
  0x46   :  { %2036 = vmatmul.mubr.msk.f32.gmra.mrb[12].mxu0 %vm104_vm0, %v92_v16 }
  0x47   :  { %2038 = vmatprep.mubr.msk.f32.mxu0 %vm104_vm0, %v93_v17 }
  0x4a   :  { %2039 = vmatmul.mubr.msk.f32.gmra.mrb[14].mxu0 %vm104_vm0, %v94_v18 }
  0x4b   :  { %2199 = vmatprep.mubr.msk.f32.mxu0 %vm2596_vm1, %v2597_v20 }
 0x101   :  { %v2019_v22 = vpop.f32.mrb[0].mxu0 }
 0x102   :  { %v225_v23 = vadd.f32 %v2019_v22, %v2787_v21  ;;  %v219_v24 = vpop.f32.mrb[1].mxu0 }
 0x103   :  { %v220_v25 = vadd.f32 %v2787_v21, %v219_v24 }
 0x104   :  { %vm299_vm2 = vcmp.ge.f32.partialorder %v225_v23, 0.0  ;;  %v315_v26 = vmul.f32 0.01, %v225_v23 }
 0x105   :  { %vm298_vm3 = vcmp.ge.f32.partialorder %v220_v25, 0.0  ;;  %v314_v27 = vmul.f32 0.01, %v220_v25  ;;  %v2022_v28 = vpop.f32.mrb[2].mxu0 }
 0x106   :  { %v235_v29 = vadd.f32 %v2022_v28, %v2787_v21  ;;  %v229_v30 = vpop.f32.mrb[3].mxu0  ;;  %v2792_v31 = vsel %vm299_vm2, %v225_v23, %v315_v26 }
 0x107   :  { %v230_v32 = vadd.f32 %v2787_v21, %v229_v30  ;;  %v2795_v33 = vsel %vm298_vm3, %v220_v25, %v314_v27 }
 0x108   :  { %vm301_vm4 = vcmp.ge.f32.partialorder %v235_v29, 0.0  ;;  %v317_v34 = vmul.f32 0.01, %v235_v29  ;;  %v2242_v35 = vpack.c.bf16 %v2792_v31, %v2795_v33 }
 0x109   :  { %vm300_vm5 = vcmp.ge.f32.partialorder %v230_v32, 0.0  ;;  %v316_v36 = vmul.f32 0.01, %v230_v32  ;;  %v2025_v37 = vpop.f32.mrb[4].mxu0 }
 0x10a   :  { %v2799_v38 = vsel %vm301_vm4, %v235_v29, %v317_v34  ;;  %v245_v39 = vadd.f32 %v2025_v37, %v2787_v21  ;;  %v239_v40 = vpop.f32.mrb[5].mxu0  ;;  %2243 = vmatpush3.bf16.msra.mxu1 %v2242_v35  ;;  %v416_v34 = vmul.f32 %v2795_v33, %v2795_v33 }
 0x10b   :  { %v2802_v41 = vsel %vm300_vm5, %v230_v32, %v316_v36  ;;  %v240_v42 = vadd.f32 %v2787_v21, %v239_v40  ;;  %2244 = vmatprep.subr.bf16.mxu1 %v2595_v19  ;;  %v419_v36 = vmul.f32 %v2799_v38, %v2799_v38  ;;  %v2598_v40 = vmov 0.0078125  }
 0x10c   :  { %vm303_vm6 = vcmp.ge.f32.partialorder %v245_v39, 0.0  ;;  %v319_v43 = vmul.f32 0.01, %v245_v39  ;;  %v2245_v44 = vpack.c.bf16 %v2799_v38, %v2802_v41  ;;  %v418_v37 = vmul.f32 %v2802_v41, %v2802_v41 }
 0x10d   :  { %vm302_vm7 = vcmp.ge.f32.partialorder %v240_v42, 0.0  ;;  %v318_v45 = vmul.f32 0.01, %v240_v42  ;;  %v2028_v46 = vpop.f32.mrb[6].mxu0 }
 0x10e   :  { %v2808_v47 = vsel %vm303_vm6, %v245_v39, %v319_v43  ;;  %v255_v48 = vadd.f32 %v2028_v46, %v2787_v21  ;;  %v249_v49 = vpop.f32.mrb[7].mxu0  ;;  %2246 = vmatpush3.bf16.msra.mxu1 %v2245_v44  ;;  %v2269_v44 = vpack.c.bf16 %v419_v36, %v418_v37 }
 0x10f   :  { %v2811_v50 = vsel %vm302_vm7, %v240_v42, %v318_v45  ;;  %v250_v51 = vadd.f32 %v2787_v21, %v249_v49  ;;  %2247 = vmatprep.subr.bf16.mxu1 %v2595_v19  ;;  %v421_v42 = vmul.f32 %v2808_v47, %v2808_v47 }
 0x110   :  { %vm305_vm8 = vcmp.ge.f32.partialorder %v255_v48, 0.0  ;;  %v321_v52 = vmul.f32 0.01, %v255_v48  ;;  %v2248_v53 = vpack.c.bf16 %v2808_v47, %v2811_v50  ;;  %v420_v43 = vmul.f32 %v2811_v50, %v2811_v50 }
 0x111   :  { %vm304_vm9 = vcmp.ge.f32.partialorder %v250_v51, 0.0  ;;  %v320_v54 = vmul.f32 0.01, %v250_v51  ;;  %v2031_v55 = vpop.f32.mrb[8].mxu0 }
 0x112   :  { %v2817_v56 = vsel %vm305_vm8, %v255_v48, %v321_v52  ;;  %v265_v57 = vadd.f32 %v2031_v55, %v2787_v21  ;;  %v259_v58 = vpop.f32.mrb[9].mxu0  ;;  %2249 = vmatpush3.bf16.msra.mxu1 %v2248_v53  ;;  %v2272_v48 = vpack.c.bf16 %v421_v42, %v420_v43 }
 0x113   :  { %v2820_v59 = vsel %vm304_vm9, %v250_v51, %v320_v54  ;;  %v260_v60 = vadd.f32 %v2787_v21, %v259_v58  ;;  %2250 = vmatprep.subr.bf16.mxu1 %v2595_v19  ;;  %v423_v45 = vmul.f32 %v2817_v56, %v2817_v56 }
 0x114   :  { %vm307_vm10 = vcmp.ge.f32.partialorder %v265_v57, 0.0  ;;  %v323_v61 = vmul.f32 0.01, %v265_v57  ;;  %v2251_v62 = vpack.c.bf16 %v2817_v56, %v2820_v59  ;;  %v422_v46 = vmul.f32 %v2820_v59, %v2820_v59 }
 0x115   :  { %vm306_vm11 = vcmp.ge.f32.partialorder %v260_v60, 0.0  ;;  %v322_v63 = vmul.f32 0.01, %v260_v60  ;;  %v2034_v0 = vpop.f32.mrb[10].mxu0 }
 0x116   :  { %v2826_v1 = vsel %vm307_vm10, %v265_v57, %v323_v61  ;;  %v275_v2 = vadd.f32 %v2034_v0, %v2787_v21  ;;  %v269_v3 = vpop.f32.mrb[11].mxu0  ;;  %2252 = vmatpush3.bf16.msra.mxu1 %v2251_v62  ;;  %v2275_v52 = vpack.c.bf16 %v423_v45, %v422_v46 }
 0x117   :  { %v2829_v4 = vsel %vm306_vm11, %v260_v60, %v322_v63  ;;  %v270_v5 = vadd.f32 %v2787_v21, %v269_v3  ;;  %2253 = vmatprep.subr.bf16.mxu1 %v2595_v19  ;;  %v425_v49 = vmul.f32 %v2826_v1, %v2826_v1  ;;  %v554_v3 = vld [vmem:[%s3435_s5 + $0x8] sm:$0xff] }
 0x118   :  { %vm309_vm12 = vcmp.ge.f32.partialorder %v275_v2, 0.0  ;;  %v325_v6 = vmul.f32 0.01, %v275_v2  ;;  %v2254_v7 = vpack.c.bf16 %v2826_v1, %v2829_v4  ;;  %v424_v51 = vmul.f32 %v2829_v4, %v2829_v4 }
 0x119   :  { %vm308_vm13 = vcmp.ge.f32.partialorder %v270_v5, 0.0  ;;  %v324_v8 = vmul.f32 0.01, %v270_v5  ;;  %v2037_v9 = vpop.f32.mrb[12].mxu0 }
 0x11a   :  { %v2835_v10 = vsel %vm309_vm12, %v275_v2, %v325_v6  ;;  %v285_v11 = vadd.f32 %v2037_v9, %v2787_v21  ;;  %v279_v12 = vpop.f32.mrb[13].mxu0  ;;  %2255 = vmatpush3.bf16.msra.mxu1 %v2254_v7  ;;  %v2278_v55 = vpack.c.bf16 %v425_v49, %v424_v51  ;;  %v553_v2 = vld [vmem:[%s3435_s5] sm:$0xff]  ;;  %v556_v7 = vld [vmem:[%s3435_s5 + $0x18] sm:$0xff] }
 0x11b   :  { %v2838_v13 = vsel %vm308_vm13, %v270_v5, %v324_v8  ;;  %v280_v14 = vadd.f32 %v2787_v21, %v279_v12  ;;  %2256 = vmatprep.subr.bf16.mxu1 %v2595_v19  ;;  %v427_v53 = vmul.f32 %v2835_v10, %v2835_v10  ;;  %v555_v5 = vld [vmem:[%s3435_s5 + $0x10] sm:$0xff]  ;;  %v2289_v6 = vpack.c.bf16 %v554_v3, %v553_v2  ;;  %v557_v9 = vld [vmem:[%s3435_s5 + $0x20] sm:$0xff] }
 0x11c   :  { %vm311_vm14 = vcmp.ge.f32.partialorder %v285_v11, 0.0  ;;  %v327_v15 = vmul.f32 0.01, %v285_v11  ;;  %v2257_v16 = vpack.c.bf16 %v2835_v10, %v2838_v13  ;;  %v426_v54 = vmul.f32 %v2838_v13, %v2838_v13  ;;  %v506_v51 = vld [vmem:[%s3433_s3] sm:$0x1] }
 0x11d   :  { %vm310_vm15 = vcmp.ge.f32.partialorder %v280_v14, 0.0  ;;  %v326_v17 = vmul.f32 0.01, %v280_v14  ;;  %v2040_v18 = vpop.f32.mrb[14].mxu0  ;;  %v2293_v8 = vpack.c.bf16 %v556_v7, %v555_v5 }
 0x11e   :  { %v2844_v22 = vsel %vm311_vm14, %v285_v11, %v327_v15  ;;  %v295_v23 = vadd.f32 %v2040_v18, %v2787_v21  ;;  %v289_v24 = vpop.f32.mrb[15].mxu0  ;;  %2258 = vmatpush3.bf16.msra.mxu1 %v2257_v16  ;;  %v2281_v60 = vpack.c.bf16 %v427_v53, %v426_v54  ;;  %v558_v11 = vld [vmem:[%s3435_s5 + $0x28] sm:$0xff]  ;;  %v560_v15 = vld [vmem:[%s3435_s5 + $0x38] sm:$0xff] }
 0x11f   :  { %v2847_v25 = vsel %vm310_vm15, %v280_v14, %v326_v17  ;;  %v290_v26 = vadd.f32 %v2787_v21, %v289_v24  ;;  %2259 = vmatprep.subr.bf16.mxu1 %v2595_v19  ;;  %v417_v21 = vmul.f32 %v2792_v31, %v2792_v31  ;;  %v429_v57 = vmul.f32 %v2844_v22, %v2844_v22  ;;  %v559_v14 = vld [vmem:[%s3435_s5 + $0x30] sm:$0xff]  ;;  %v561_v17 = vld [vmem:[%s3435_s5 + $0x40] sm:$0xff]  ;;  %v562_v18 = vld [vmem:[%s3435_s5 + $0x48] sm:$0xff] }
 0x120   :  { %vm313_vm0 = vcmp.ge.f32.partialorder %v295_v23, 0.0  ;;  %v329_v27 = vmul.f32 0.01, %v295_v23  ;;  %v2260_v28 = vpack.c.bf16 %v2844_v22, %v2847_v25  ;;  %v428_v58 = vmul.f32 %v2847_v25, %v2847_v25  ;;  %v563_v24 = vld [vmem:[%s3435_s5 + $0x50] sm:$0xff] }
 0x121   :  { %vm312_vm2 = vcmp.ge.f32.partialorder %v290_v26, 0.0  ;;  %v328_v29 = vmul.f32 0.01, %v290_v26  ;;  %v2266_v39 = vpack.c.bf16 %v417_v21, %v416_v34  ;;  %v2297_v12 = vpack.c.bf16 %v558_v11, %v557_v9  ;;  %v567_v21 = vld [vmem:[%s3435_s5 + $0x70] sm:$0xff] }
 0x122   :  { %v2853_v30 = vsel %vm313_vm0, %v295_v23, %v329_v27  ;;  %2261 = vmatpush3.bf16.msra.mxu1 %v2260_v28  ;;  %v2284_v63 = vpack.c.bf16 %v429_v57, %v428_v58  ;;  %v2301_v16 = vpack.c.bf16 %v560_v15, %v559_v14  ;;  %v2305_v23 = vpack.c.bf16 %v562_v18, %v561_v17  ;;  %v565_v28 = vld [vmem:[%s3435_s5 + $0x60] sm:$0xff] }
 0x123   :  { %v2855_v32 = vsel %vm312_vm2, %v290_v26, %v328_v29  ;;  %2262 = vmatprep.subr.bf16.mxu1 %v2595_v19  ;;  %v431_v61 = vmul.f32 %v2853_v30, %v2853_v30  ;;  %v564_v26 = vld [vmem:[%s3435_s5 + $0x58] sm:$0xff]  ;;  %v566_v29 = vld [vmem:[%s3435_s5 + $0x68] sm:$0xff] }
 0x124   :  { %v2263_v35 = vpack.c.bf16 %v2853_v30, %v2855_v32  ;;  %v430_v62 = vmul.f32 %v2855_v32, %v2855_v32  ;;  %v2309_v27 = vpack.c.bf16 %v564_v26, %v563_v24  ;;  %v2313_v34 = vpack.c.bf16 %v566_v29, %v565_v28 }
 0x126   :  { %2264 = vmatpush3.bf16.msra.mxu1 %v2263_v35  ;;  %v2287_v0 = vpack.c.bf16 %v431_v61, %v430_v62  ;;  %v568_v35 = vld [vmem:[%s3435_s5 + $0x78] sm:$0xff] }
 0x127   :  { %2265 = vmatprep.subr.bf16.mxu1 %v2595_v19  ;;  %v2317_v36 = vpack.c.bf16 %v568_v35, %v567_v21 }
 0x129   :  { %2074 = vmatmul.mubr.f32.vlgmr.msra.gmra.mrb[0].mxu1 %v2598_v40 }
 0x12a   :  { %2267 = vmatpush3.bf16.msra.mxu1 %v2266_v39  ;;  %2108 = vmatprep.mubr.msk.f32.mxu1 %vm2596_vm1, %v2597_v20 }
 0x12b   :  { %2268 = vmatprep.subr.bf16.mxu1 %v2595_v19 }
 0x12e   :  { %2270 = vmatpush3.bf16.msra.mxu1 %v2269_v44 }
 0x12f   :  { %2271 = vmatprep.subr.bf16.mxu1 %v2595_v19 }
 0x132   :  { %2273 = vmatpush3.bf16.msra.mxu1 %v2272_v48  ;;  %v511_v48 = vlaneseq }
 0x133   :  { %2274 = vmatprep.subr.bf16.mxu1 %v2595_v19 }
 0x134   :  { %v2953_v49 = vshrl.u32 %v511_v48, 7 }
 0x136   :  { %2276 = vmatpush3.bf16.msra.mxu1 %v2275_v52  ;;  %v2959_v52 = vsub.s32 0, %v2953_v49 }
 0x137   :  { %2277 = vmatprep.subr.bf16.mxu1 %v2595_v19 }
 0x13a   :  { %2279 = vmatpush3.bf16.msra.mxu1 %v2278_v55  ;;  %v508_v55 = vld [vmem:[%s3434_s4] sm:$0x1] }
 0x13b   :  { %2280 = vmatprep.subr.bf16.mxu1 %v2595_v19 }
 0x13e   :  { %2282 = vmatpush3.bf16.msra.mxu1 %v2281_v60 }
 0x13f   :  { %2283 = vmatprep.subr.bf16.mxu1 %v2595_v19 }
 0x142   :  { %2285 = vmatpush3.bf16.msra.mxu1 %v2284_v63 }
 0x143   :  { %2286 = vmatprep.subr.bf16.mxu1 %v2595_v19 }
 0x146   :  { %2288 = vmatpush3.bf16.msra.mxu1 %v2287_v0 }
 0x147   :  { %2290 = vmatprep.subr.bf16.mxu1 %v2289_v6 }
 0x149   :  { %2109 = vmatmul.mubr.f32.vlgmr.msra.gmra.mrb[2].mxu1 %v2598_v40 }
 0x14a   :  { %2292 = vmatpush3.bf16.msra.mxu1 %v2289_v6 }
 0x14b   :  { %2294 = vmatprep.subr.bf16.mxu1 %v2293_v8 }
 0x14e   :  { %2296 = vmatpush3.bf16.msra.mxu1 %v2293_v8 }
 0x14f   :  { %2298 = vmatprep.subr.bf16.mxu1 %v2297_v12 }
 0x152   :  { %2300 = vmatpush3.bf16.msra.mxu1 %v2297_v12 }
 0x153   :  { %2302 = vmatprep.subr.bf16.mxu1 %v2301_v16 }
 0x156   :  { %2304 = vmatpush3.bf16.msra.mxu1 %v2301_v16 }
 0x157   :  { %2306 = vmatprep.subr.bf16.mxu1 %v2305_v23 }
 0x15a   :  { %2308 = vmatpush3.bf16.msra.mxu1 %v2305_v23 }
 0x15b   :  { %2310 = vmatprep.subr.bf16.mxu1 %v2309_v27 }
 0x15e   :  { %2312 = vmatpush3.bf16.msra.mxu1 %v2309_v27 }
 0x15f   :  { %2314 = vmatprep.subr.bf16.mxu1 %v2313_v34 }
 0x162   :  { %2316 = vmatpush3.bf16.msra.mxu1 %v2313_v34 }
 0x163   :  { %2318 = vmatprep.subr.bf16.mxu1 %v2317_v36 }
 0x166   :  { %2320 = vmatpush3.bf16.msra.mxu1 %v2317_v36 }
 0x167   :  { %2345 = vmatprep.subr.bf16.mxu1 %v2595_v19 }
 0x1fc   :  { %v412_v37 = vpop.f32.mrb[0].mxu1 }
 0x1fd   :  { %v2075_v39 = vpop.f32.mrb[1].mxu1  ;;  %v502_v42 = vmul.f32 %v412_v37, %v412_v37 }
 0x21c   :  { %v498_v43 = vpop.f32.mrb[2].mxu1 }
 0x21d   :  { %v503_v44 = vsub.f32 %v498_v43, %v502_v42  ;;  %v2110_v45 = vpop.f32.mrb[3].mxu1 }
 0x21f   :  { %v504_v46 = vadd.f32 1e-05, %v503_v44 }
 0x221   :  { %2509 = vrsqrt.f32 %v504_v46 }
 0x22b   :  { %v2510_v53 = vpop.eup %2509 }
 0x22c   :  { %v507_v54 = vmul.f32 %v2510_v53, %v506_v51 }
 0x22e   :  { %v509_v57 = vmul.f32 %v507_v54, %v412_v37  ;;  %v514_v58 = vrot.slane %v507_v54, %v2959_v52 }
 0x230   :  { %v510_v60 = vsub.f32 %v508_v55, %v509_v57  ;;  %v515_v61 = vmul.f32 %v514_v58, %v2795_v33  ;;  %v516_v62 = vmul.f32 %v514_v58, %v2792_v31  ;;  %v517_v63 = vmul.f32 %v514_v58, %v2802_v41 }
 0x231   :  { %v518_v0 = vmul.f32 %v514_v58, %v2799_v38  ;;  %v519_v2 = vmul.f32 %v514_v58, %v2811_v50  ;;  %v520_v3 = vmul.f32 %v514_v58, %v2808_v47  ;;  %v521_v5 = vmul.f32 %v514_v58, %v2820_v59 }
 0x232   :  { %v535_v6 = vrot.slane %v510_v60, %v2959_v52  ;;  %v522_v7 = vmul.f32 %v514_v58, %v2817_v56  ;;  %v523_v8 = vmul.f32 %v514_v58, %v2829_v4  ;;  %v524_v33 = vmul.f32 %v514_v58, %v2826_v1 }
 0x233   :  { %v525_v31 = vmul.f32 %v514_v58, %v2838_v13  ;;  %v526_v41 = vmul.f32 %v514_v58, %v2835_v10  ;;  %v527_v38 = vmul.f32 %v514_v58, %v2847_v25  ;;  %v528_v50 = vmul.f32 %v514_v58, %v2844_v22 }
 0x234   :  { %v537_v9 = vadd.f32 %v535_v6, %v515_v61  ;;  %v538_v47 = vadd.f32 %v535_v6, %v516_v62  ;;  %v539_v11 = vadd.f32 %v535_v6, %v517_v63  ;;  %v540_v59 = vadd.f32 %v535_v6, %v518_v0 }
 0x235   :  { %v541_v12 = vadd.f32 %v535_v6, %v519_v2  ;;  %v542_v14 = vadd.f32 %v535_v6, %v520_v3  ;;  %v543_v15 = vadd.f32 %v535_v6, %v521_v5  ;;  %v544_v56 = vadd.f32 %v535_v6, %v522_v7 }
 0x236   :  { %2143 = vmatprep.mubr.f32.mxu1 %v537_v9  ;;  %v545_v4 = vadd.f32 %v535_v6, %v523_v8  ;;  %v546_v16 = vadd.f32 %v535_v6, %v524_v33  ;;  %v547_v1 = vadd.f32 %v535_v6, %v525_v31  ;;  %v548_v17 = vadd.f32 %v535_v6, %v526_v41 }
 0x237   :  { %2144 = vmatmul.mubr.f32.vlgmr.msra.gmra.mrb[4].mxu1 %v538_v47  ;;  %v549_v13 = vadd.f32 %v535_v6, %v527_v38  ;;  %v550_v10 = vadd.f32 %v535_v6, %v528_v50  ;;  %v529_v25 = vmul.f32 %v514_v58, %v2855_v32  ;;  %v530_v22 = vmul.f32 %v514_v58, %v2853_v30  ;;  %v2987_v30 = vld [vmem:[%s3436_s6] ss:$0 sm:$0xff] }
 0x238   :  { %2146 = vmatprep.mubr.f32.mxu1 %v539_v11 }
 0x239   :  { %v551_v18 = vadd.f32 %v535_v6, %v529_v25  ;;  %v552_v23 = vadd.f32 %v535_v6, %v530_v22 }
 0x23b   :  { %2147 = vmatmul.mubr.f32.gmra.mrb[6].mxu1 %v540_v59 }
 0x23c   :  { %2149 = vmatprep.mubr.f32.mxu1 %v541_v12 }
 0x23f   :  { %2150 = vmatmul.mubr.f32.gmra.mrb[8].mxu1 %v542_v14 }
 0x240   :  { %2152 = vmatprep.mubr.f32.mxu1 %v543_v15 }
 0x243   :  { %2153 = vmatmul.mubr.f32.gmra.mrb[10].mxu1 %v544_v56 }
 0x244   :  { %2155 = vmatprep.mubr.f32.mxu1 %v545_v4 }
 0x247   :  { %2156 = vmatmul.mubr.f32.gmra.mrb[12].mxu1 %v546_v16 }
 0x248   :  { %2158 = vmatprep.mubr.f32.mxu1 %v547_v1 }
 0x24b   :  { %2159 = vmatmul.mubr.f32.gmra.mrb[14].mxu1 %v548_v17 }
 0x24c   :  { %2161 = vmatprep.mubr.f32.mxu1 %v549_v13 }
 0x24f   :  { %2162 = vmatmul.mubr.f32.gmra.mrb[16].mxu1 %v550_v10 }
 0x250   :  { %2164 = vmatprep.mubr.f32.mxu1 %v551_v18 }
 0x253   :  { %2165 = vmatmul.mubr.f32.gmra.mrb[18].mxu1 %v552_v23 }
 0x254   :  { %2234 = vmatprep.mubr.msk.f32.mxu1 %vm2596_vm1, %v2597_v20 }
 0x30a   :  { %v2145_v32 = vpop.f32.mrb[4].mxu1 }
 0x30b   :  { %v648_v24 = vadd.f32 %v2145_v32, %v2987_v30  ;;  %v642_v26 = vpop.f32.mrb[5].mxu1 }
 0x30c   :  { %v643_v27 = vadd.f32 %v2987_v30, %v642_v26 }
 0x30d   :  { %vm722_vm3 = vcmp.ge.f32.partialorder %v648_v24, 0.0  ;;  %v738_v28 = vmul.f32 0.01, %v648_v24 }
 0x30e   :  { %vm721_vm4 = vcmp.ge.f32.partialorder %v643_v27, 0.0  ;;  %v737_v29 = vmul.f32 0.01, %v643_v27  ;;  %v2148_v34 = vpop.f32.mrb[6].mxu1 }
 0x30f   :  { %v2991_v21 = vsel %vm722_vm3, %v648_v24, %v738_v28  ;;  %v658_v35 = vadd.f32 %v2148_v34, %v2987_v30  ;;  %v652_v36 = vpop.f32.mrb[7].mxu1 }
 0x310   :  { %v840_v37 = vmul.f32 %v2991_v21, %v2991_v21  ;;  %v2996_v39 = vsel %vm721_vm4, %v643_v27, %v737_v29  ;;  %v653_v42 = vadd.f32 %v2987_v30, %v652_v36 }
 0x311   :  { %v2322_v43 = vpack.c.bf16 %v2991_v21, %v2996_v39  ;;  %v839_v44 = vmul.f32 %v2996_v39, %v2996_v39  ;;  %vm724_vm1 = vcmp.ge.f32.partialorder %v658_v35, 0.0  ;;  %v740_v45 = vmul.f32 0.01, %v658_v35 }
 0x312   :  { %vm723_vm5 = vcmp.ge.f32.partialorder %v653_v42, 0.0  ;;  %v739_v46 = vmul.f32 0.01, %v653_v42  ;;  %v2151_v48 = vpop.f32.mrb[8].mxu1 }
 0x313   :  { %v3003_v51 = vsel %vm724_vm1, %v658_v35, %v740_v45  ;;  %v668_v53 = vadd.f32 %v2151_v48, %v2987_v30  ;;  %v662_v54 = vpop.f32.mrb[9].mxu1  ;;  %2323 = vmatpush3.bf16.msra.mxu0 %v2322_v43  ;;  %v2346_v55 = vpack.c.bf16 %v840_v37, %v839_v44 }
 0x314   :  { %v842_v57 = vmul.f32 %v3003_v51, %v3003_v51  ;;  %v3008_v58 = vsel %vm723_vm5, %v653_v42, %v739_v46  ;;  %v663_v60 = vadd.f32 %v2987_v30, %v662_v54  ;;  %2324 = vmatprep.subr.bf16.mxu0 %v2595_v19 }
 0x315   :  { %v2325_v61 = vpack.c.bf16 %v3003_v51, %v3008_v58  ;;  %v841_v62 = vmul.f32 %v3008_v58, %v3008_v58  ;;  %vm726_vm6 = vcmp.ge.f32.partialorder %v668_v53, 0.0  ;;  %v742_v63 = vmul.f32 0.01, %v668_v53  ;;  %2347 = vmatpush3.bf16.msra.mxu1 %v2346_v55 }
 0x316   :  { %vm725_vm7 = vcmp.ge.f32.partialorder %v663_v60, 0.0  ;;  %v741_v0 = vmul.f32 0.01, %v663_v60  ;;  %v2154_v2 = vpop.f32.mrb[10].mxu1  ;;  %2348 = vmatprep.subr.bf16.mxu1 %v2595_v19 }
 0x317   :  { %v3017_v3 = vsel %vm726_vm6, %v668_v53, %v742_v63  ;;  %v678_v5 = vadd.f32 %v2154_v2, %v2987_v30  ;;  %v672_v6 = vpop.f32.mrb[11].mxu1  ;;  %2326 = vmatpush3.bf16.msra.mxu0 %v2325_v61  ;;  %v2349_v7 = vpack.c.bf16 %v842_v57, %v841_v62 }
 0x318   :  { %v844_v8 = vmul.f32 %v3017_v3, %v3017_v3  ;;  %v3022_v33 = vsel %vm725_vm7, %v663_v60, %v741_v0  ;;  %v673_v31 = vadd.f32 %v2987_v30, %v672_v6  ;;  %2327 = vmatprep.subr.bf16.mxu0 %v2595_v19 }
 0x319   :  { %v2328_v41 = vpack.c.bf16 %v3017_v3, %v3022_v33  ;;  %v843_v38 = vmul.f32 %v3022_v33, %v3022_v33  ;;  %vm728_vm8 = vcmp.ge.f32.partialorder %v678_v5, 0.0  ;;  %v744_v50 = vmul.f32 0.01, %v678_v5  ;;  %2350 = vmatpush3.bf16.msra.mxu1 %v2349_v7 }
 0x31a   :  { %vm727_vm9 = vcmp.ge.f32.partialorder %v673_v31, 0.0  ;;  %v743_v9 = vmul.f32 0.01, %v673_v31  ;;  %v2157_v47 = vpop.f32.mrb[12].mxu1  ;;  %2351 = vmatprep.subr.bf16.mxu1 %v2595_v19 }
 0x31b   :  { %v3031_v11 = vsel %vm728_vm8, %v678_v5, %v744_v50  ;;  %v688_v59 = vadd.f32 %v2157_v47, %v2987_v30  ;;  %v682_v12 = vpop.f32.mrb[13].mxu1  ;;  %2329 = vmatpush3.bf16.msra.mxu0 %v2328_v41  ;;  %v2352_v14 = vpack.c.bf16 %v844_v8, %v843_v38  ;;  %v979_v41 = vld [vmem:[#allocation2 + $0x18] sm:$0xff] }
 0x31c   :  { %v846_v15 = vmul.f32 %v3031_v11, %v3031_v11  ;;  %v3036_v56 = vsel %vm727_vm9, %v673_v31, %v743_v9  ;;  %v683_v4 = vadd.f32 %v2987_v30, %v682_v12  ;;  %2330 = vmatprep.subr.bf16.mxu0 %v2595_v19  ;;  %v977_v31 = vld [vmem:[#allocation2 + $0x8] sm:$0xff]  ;;  %v976_v12 = vld [vmem:[#allocation2] sm:$0xff] }
 0x31d   :  { %v2331_v16 = vpack.c.bf16 %v3031_v11, %v3036_v56  ;;  %v845_v1 = vmul.f32 %v3036_v56, %v3036_v56  ;;  %vm730_vm10 = vcmp.ge.f32.partialorder %v688_v59, 0.0  ;;  %v746_v17 = vmul.f32 0.01, %v688_v59  ;;  %2353 = vmatpush3.bf16.msra.mxu1 %v2352_v14  ;;  %v978_v14 = vld [vmem:[#allocation2 + $0x10] sm:$0xff] }
 0x31e   :  { %vm729_vm11 = vcmp.ge.f32.partialorder %v683_v4, 0.0  ;;  %v745_v13 = vmul.f32 0.01, %v683_v4  ;;  %v2160_v10 = vpop.f32.mrb[14].mxu1  ;;  %2354 = vmatprep.subr.bf16.mxu1 %v2595_v19 }
 0x31f   :  { %v3045_v25 = vsel %vm730_vm10, %v688_v59, %v746_v17  ;;  %v698_v22 = vadd.f32 %v2160_v10, %v2987_v30  ;;  %v692_v18 = vpop.f32.mrb[15].mxu1  ;;  %2332 = vmatpush3.bf16.msra.mxu0 %v2331_v16  ;;  %v2355_v23 = vpack.c.bf16 %v846_v15, %v845_v1  ;;  %v2369_v59 = vpack.c.bf16 %v979_v41, %v977_v31  ;;  %v981_v17 = vld [vmem:[#allocation2 + $0x28] sm:$0xff]  ;;  %v980_v10 = vld [vmem:[#allocation2 + $0x20] sm:$0xff] }
 0x320   :  { %v848_v32 = vmul.f32 %v3045_v25, %v3045_v25  ;;  %v3050_v24 = vsel %vm729_vm11, %v683_v4, %v745_v13  ;;  %v693_v26 = vadd.f32 %v2987_v30, %v692_v18  ;;  %2333 = vmatprep.subr.bf16.mxu0 %v2595_v19  ;;  %v2371_v1 = vpack.c.bf16 %v978_v14, %v976_v12  ;;  %v983_v13 = vld [vmem:[#allocation2 + $0x38] sm:$0xff]  ;;  %v982_v18 = vld [vmem:[#allocation2 + $0x30] sm:$0xff]  ;;  %v1000_v31 = vld [vmem:[#allocation2 + $0xc0] sm:$0xff] }
 0x321   :  { %v2334_v27 = vpack.c.bf16 %v3045_v25, %v3050_v24  ;;  %v847_v28 = vmul.f32 %v3050_v24, %v3050_v24  ;;  %vm732_vm12 = vcmp.ge.f32.partialorder %v698_v22, 0.0  ;;  %v748_v29 = vmul.f32 0.01, %v698_v22  ;;  %2356 = vmatpush3.bf16.msra.mxu1 %v2355_v23  ;;  %v985_v23 = vld [vmem:[#allocation2 + $0x48] sm:$0xff]  ;;  %v1004_v14 = vld [vmem:[#allocation2 + $0xe0] sm:$0xff] }
 0x322   :  { %vm731_vm13 = vcmp.ge.f32.partialorder %v693_v26, 0.0  ;;  %v747_v34 = vmul.f32 0.01, %v693_v26  ;;  %v2163_v35 = vpop.f32.mrb[16].mxu1  ;;  %2357 = vmatprep.subr.bf16.mxu1 %v2595_v19 }
 0x323   :  { %v3059_v36 = vsel %vm732_vm12, %v698_v22, %v748_v29  ;;  %v708_v37 = vadd.f32 %v2163_v35, %v2987_v30  ;;  %v702_v42 = vpop.f32.mrb[17].mxu1  ;;  %2335 = vmatpush3.bf16.msra.mxu0 %v2334_v27  ;;  %v2358_v43 = vpack.c.bf16 %v848_v32, %v847_v28  ;;  %v2373_v22 = vpack.c.bf16 %v983_v13, %v981_v17  ;;  %v987_v32 = vld [vmem:[#allocation2 + $0x58] sm:$0xff]  ;;  %v984_v27 = vld [vmem:[#allocation2 + $0x40] sm:$0xff]  ;;  %v986_v28 = vld [vmem:[#allocation2 + $0x50] sm:$0xff] }
 0x324   :  { %v850_v44 = vmul.f32 %v3059_v36, %v3059_v36  ;;  %v3064_v45 = vsel %vm731_vm13, %v693_v26, %v747_v34  ;;  %v703_v46 = vadd.f32 %v2987_v30, %v702_v42  ;;  %2336 = vmatprep.subr.bf16.mxu0 %v2595_v19  ;;  %v2377_v26 = vpack.c.bf16 %v987_v32, %v985_v23  ;;  %v989_v34 = vld [vmem:[#allocation2 + $0x68] sm:$0xff]  ;;  %v991_v35 = vld [vmem:[#allocation2 + $0x78] sm:$0xff]  ;;  %v988_v42 = vld [vmem:[#allocation2 + $0x60] sm:$0xff] }
 0x325   :  { %v2337_v48 = vpack.c.bf16 %v3059_v36, %v3064_v45  ;;  %v849_v53 = vmul.f32 %v3064_v45, %v3064_v45  ;;  %vm734_vm14 = vcmp.ge.f32.partialorder %v708_v37, 0.0  ;;  %v750_v54 = vmul.f32 0.01, %v708_v37  ;;  %2359 = vmatpush3.bf16.msra.mxu1 %v2358_v43  ;;  %v990_v43 = vld [vmem:[#allocation2 + $0x70] sm:$0xff] }
 0x326   :  { %vm733_vm15 = vcmp.ge.f32.partialorder %v703_v46, 0.0  ;;  %v749_v55 = vmul.f32 0.01, %v703_v46  ;;  %v2166_v57 = vpop.f32.mrb[18].mxu1  ;;  %2360 = vmatprep.subr.bf16.mxu1 %v2595_v19  ;;  %v2379_v29 = vpack.c.bf16 %v986_v28, %v984_v27 }
 0x327   :  { %v3073_v60 = vsel %vm734_vm14, %v708_v37, %v750_v54  ;;  %v718_v61 = vadd.f32 %v2166_v57, %v2987_v30  ;;  %v712_v62 = vpop.f32.mrb[19].mxu1  ;;  %2338 = vmatpush3.bf16.msra.mxu0 %v2337_v48  ;;  %v2361_v63 = vpack.c.bf16 %v850_v44, %v849_v53  ;;  %v2381_v37 = vpack.c.bf16 %v991_v35, %v989_v34  ;;  %v995_v48 = vld [vmem:[#allocation2 + $0x98] sm:$0xff]  ;;  %v992_v54 = vld [vmem:[#allocation2 + $0x80] sm:$0xff] }
 0x328   :  { %v852_v0 = vmul.f32 %v3073_v60, %v3073_v60  ;;  %v3078_v2 = vsel %vm733_vm15, %v703_v46, %v749_v55  ;;  %v713_v5 = vadd.f32 %v2987_v30, %v712_v62  ;;  %2339 = vmatprep.subr.bf16.mxu0 %v2595_v19  ;;  %v2383_v44 = vpack.c.bf16 %v990_v43, %v988_v42  ;;  %v993_v46 = vld [vmem:[#allocation2 + $0x88] sm:$0xff]  ;;  %v994_v55 = vld [vmem:[#allocation2 + $0x90] sm:$0xff]  ;;  %v999_v62 = vld [vmem:[#allocation2 + $0xb8] sm:$0xff] }
 0x329   :  { %v2340_v6 = vpack.c.bf16 %v3073_v60, %v3078_v2  ;;  %v851_v7 = vmul.f32 %v3078_v2, %v3078_v2  ;;  %vm736_vm0 = vcmp.ge.f32.partialorder %v718_v61, 0.0  ;;  %v752_v8 = vmul.f32 0.01, %v718_v61  ;;  %2362 = vmatpush3.bf16.msra.mxu1 %v2361_v63 }
 0x32a   :  { %vm735_vm2 = vcmp.ge.f32.partialorder %v713_v5, 0.0  ;;  %v751_v38 = vmul.f32 0.01, %v713_v5  ;;  %2363 = vmatprep.subr.bf16.mxu1 %v2595_v19  ;;  %v2385_v53 = vpack.c.bf16 %v995_v48, %v993_v46  ;;  %v2387_v57 = vpack.c.bf16 %v994_v55, %v992_v54 }
 0x32b   :  { %v3087_v50 = vsel %vm736_vm0, %v718_v61, %v752_v8  ;;  %2341 = vmatpush3.bf16.msra.mxu0 %v2340_v6  ;;  %v2364_v30 = vpack.c.bf16 %v852_v0, %v851_v7  ;;  %v997_v61 = vld [vmem:[#allocation2 + $0xa8] sm:$0xff]  ;;  %v996_v0 = vld [vmem:[#allocation2 + $0xa0] sm:$0xff]  ;;  %v1003_v8 = vld [vmem:[#allocation2 + $0xd8] sm:$0xff] }
 0x32c   :  { %v854_v9 = vmul.f32 %v3087_v50, %v3087_v50  ;;  %v3091_v47 = vsel %vm735_vm2, %v713_v5, %v751_v38  ;;  %2342 = vmatprep.subr.bf16.mxu0 %v2595_v19  ;;  %v2389_v63 = vpack.c.bf16 %v999_v62, %v997_v61  ;;  %v998_v5 = vld [vmem:[#allocation2 + $0xb0] sm:$0xff]  ;;  %v1001_v7 = vld [vmem:[#allocation2 + $0xc8] sm:$0xff] }
 0x32d   :  { %v2343_v15 = vpack.c.bf16 %v3087_v50, %v3091_v47  ;;  %v853_v4 = vmul.f32 %v3091_v47, %v3091_v47  ;;  %2365 = vmatpush3.bf16.msra.mxu1 %v2364_v30  ;;  %v2391_v6 = vpack.c.bf16 %v998_v5, %v996_v0  ;;  %v2393_v41 = vpack.c.bf16 %v1003_v8, %v1001_v7  ;;  %v1002_v38 = vld [vmem:[#allocation2 + $0xd0] sm:$0xff]  ;;  %v1005_v30 = vld [vmem:[#allocation2 + $0xe8] sm:$0xff] }
 0x32e   :  { %2366 = vmatprep.subr.bf16.mxu1 %v2595_v19  ;;  %v2375_v19 = vpack.c.bf16 %v982_v18, %v980_v10 }
 0x32f   :  { %2344 = vmatpush3.bf16.msra.mxu0 %v2343_v15  ;;  %v2367_v16 = vpack.c.bf16 %v854_v9, %v853_v4  ;;  %v1007_v9 = vld [vmem:[#allocation2 + $0xf8] sm:$0xff]  ;;  %v1006_v15 = vld [vmem:[#allocation2 + $0xf0] sm:$0xff] }
 0x330   :  { %2370 = vmatprep.subr.bf16.mxu0 %v2369_v59  ;;  %v2395_v59 = vpack.c.bf16 %v1002_v38, %v1000_v31  ;;  %v2397_v12 = vpack.c.bf16 %v1007_v9, %v1005_v30  ;;  %v2399_v4 = vpack.c.bf16 %v1006_v15, %v1004_v14 }
 0x331   :  { %2368 = vmatpush3.bf16.msra.mxu1 %v2367_v16 }
 0x332   :  { %2200 = vmatmul.mubr.f32.vlgmr.msra.gmra.mrb[16].mxu0 %v2598_v40 }
 0x333   :  { %2372 = vmatpush1.bf16.msra.mxu0 %v2371_v1  ;;  %1084 = vmatprep.mubr.f32.mxu0 %v2597_v20 }
 0x334   :  { %2235 = vmatmul.mubr.f32.vlgmr.msra.gmra.mrb[20].mxu1 %v2598_v40  ;;  %2374 = vmatprep.subr.bf16.mxu0 %v2373_v22 }
 0x335   :  { %1341 = vmatprep.mubr.f32.mxu1 %v2597_v20 }
 0x337   :  { %2376 = vmatpush1.bf16.msra.mxu0 %v2375_v19  ;;  %v929_v19 = vld [vmem:[%s3437_s7] sm:$0x1] }
 0x338   :  { %2378 = vmatprep.subr.bf16.mxu0 %v2377_v26  ;;  %v931_v26 = vld [vmem:[%s3438_s8] sm:$0x1] }
 0x33b   :  { %2380 = vmatpush1.bf16.msra.mxu0 %v2379_v29 }
 0x33c   :  { %2382 = vmatprep.subr.bf16.mxu0 %v2381_v37 }
 0x33f   :  { %2384 = vmatpush1.bf16.msra.mxu0 %v2383_v44 }
 0x340   :  { %2386 = vmatprep.subr.bf16.mxu0 %v2385_v53 }
 0x343   :  { %2388 = vmatpush1.bf16.msra.mxu0 %v2387_v57 }
 0x344   :  { %2390 = vmatprep.subr.bf16.mxu0 %v2389_v63 }
 0x347   :  { %2392 = vmatpush1.bf16.msra.mxu0 %v2391_v6 }
 0x348   :  { %2394 = vmatprep.subr.bf16.mxu0 %v2393_v41 }
 0x34b   :  { %2396 = vmatpush1.bf16.msra.mxu0 %v2395_v59 }
 0x34c   :  { %2398 = vmatprep.subr.bf16.mxu0 %v2397_v12 }
 0x34f   :  { %2400 = vmatpush1.bf16.msra.mxu0 %v2399_v4 }
 0x405   :  { %v835_v16 = vpop.f32.mrb[16].mxu0 }
 0x406   :  { %v925_v1 = vmul.f32 %v835_v16, %v835_v16  ;;  %v2201_v17 = vpop.f32.mrb[17].mxu0 }
 0x407   :  { %v921_v13 = vpop.f32.mrb[20].mxu1 }
 0x408   :  { %v926_v10 = vsub.f32 %v921_v13, %v925_v1  ;;  %v2236_v22 = vpop.f32.mrb[21].mxu1 }
 0x40a   :  { %v927_v18 = vadd.f32 1e-05, %v926_v10 }
 0x40c   :  { %2511 = vrsqrt.f32 %v927_v18 }
 0x416   :  { %v2512_v23 = vpop.eup %2511 }
 0x417   :  { %v930_v32 = vmul.f32 %v2512_v23, %v929_v19 }
 0x419   :  { %v932_v27 = vmul.f32 %v930_v32, %v835_v16  ;;  %v937_v28 = vrot.slane %v930_v32, %v2959_v52 }
 0x41b   :  { %v933_v29 = vsub.f32 %v931_v26, %v932_v27  ;;  %v938_v34 = vmul.f32 %v937_v28, %v2996_v39  ;;  %v939_v35 = vmul.f32 %v937_v28, %v2991_v21  ;;  %v940_v37 = vmul.f32 %v937_v28, %v3008_v58 }
 0x41c   :  { %v941_v42 = vmul.f32 %v937_v28, %v3003_v51  ;;  %v942_v43 = vmul.f32 %v937_v28, %v3022_v33  ;;  %v943_v44 = vmul.f32 %v937_v28, %v3017_v3  ;;  %v944_v46 = vmul.f32 %v937_v28, %v3036_v56 }
 0x41d   :  { %v958_v48 = vrot.slane %v933_v29, %v2959_v52  ;;  %v945_v53 = vmul.f32 %v937_v28, %v3031_v11  ;;  %v946_v54 = vmul.f32 %v937_v28, %v3050_v24  ;;  %v947_v39 = vmul.f32 %v937_v28, %v3045_v25 }
 0x41e   :  { %v948_v21 = vmul.f32 %v937_v28, %v3064_v45  ;;  %v949_v58 = vmul.f32 %v937_v28, %v3059_v36  ;;  %v950_v51 = vmul.f32 %v937_v28, %v3078_v2  ;;  %v951_v33 = vmul.f32 %v937_v28, %v3073_v60 }
 0x41f   :  { %v960_v55 = vadd.f32 %v958_v48, %v938_v34  ;;  %v961_v3 = vadd.f32 %v958_v48, %v939_v35  ;;  %v962_v57 = vadd.f32 %v958_v48, %v940_v37  ;;  %v963_v56 = vadd.f32 %v958_v48, %v941_v42 }
 0x420   :  { %v964_v61 = vadd.f32 %v958_v48, %v942_v43  ;;  %v965_v62 = vadd.f32 %v958_v48, %v943_v44  ;;  %v966_v63 = vadd.f32 %v958_v48, %v944_v46  ;;  %v967_v11 = vadd.f32 %v958_v48, %v945_v53 }
 0x421   :  { %1085 = vmatmul.mubr.f32.vlgmr.msra.gmra.mrb[18].mxu0 %v960_v55  ;;  %v968_v24 = vadd.f32 %v958_v48, %v946_v54  ;;  %v969_v0 = vadd.f32 %v958_v48, %v947_v39  ;;  %v970_v25 = vadd.f32 %v958_v48, %v948_v21  ;;  %v971_v5 = vadd.f32 %v958_v48, %v949_v58 }
 0x422   :  { %1090 = vmatprep.mubr.f32.mxu0 %v2597_v20  ;;  %v972_v36 = vadd.f32 %v958_v48, %v950_v51  ;;  %v973_v45 = vadd.f32 %v958_v48, %v951_v33  ;;  %v952_v2 = vmul.f32 %v937_v28, %v3091_v47  ;;  %v953_v60 = vmul.f32 %v937_v28, %v3087_v50  ;;  %v1008_v47 = vld [vmem:[%s3440_s10] sm:$0x3] }
 0x423   :  { %v3143_v50 = vsub.s32 1, %v2953_v49  ;;  %v3152_v31 = vrot.slane %v1008_v47, %v2959_v52 }
 0x424   :  { %v974_v6 = vadd.f32 %v958_v48, %v952_v2  ;;  %v975_v7 = vadd.f32 %v958_v48, %v953_v60 }
 0x425   :  { %1091 = vmatmul.mubr.f32.gmra.mrb[20].mxu0 %v961_v3  ;;  %v3149_v8 = vrot.slane %v1008_v47, %v3143_v50 }
 0x426   :  { %1096 = vmatprep.mubr.f32.mxu0 %v2597_v20 }
 0x429   :  { %1097 = vmatmul.mubr.f32.gmra.mrb[22].mxu0 %v962_v57 }
 0x42a   :  { %1102 = vmatprep.mubr.f32.mxu0 %v2597_v20 }
 0x42d   :  { %1103 = vmatmul.mubr.f32.gmra.mrb[24].mxu0 %v963_v56 }
 0x42e   :  { %1108 = vmatprep.mubr.f32.mxu0 %v2597_v20 }
 0x431   :  { %1109 = vmatmul.mubr.f32.gmra.mrb[26].mxu0 %v964_v61 }
 0x432   :  { %1114 = vmatprep.mubr.f32.mxu0 %v2597_v20 }
 0x435   :  { %1115 = vmatmul.mubr.f32.gmra.mrb[28].mxu0 %v965_v62 }
 0x436   :  { %1120 = vmatprep.mubr.f32.mxu0 %v2597_v20 }
 0x439   :  { %1121 = vmatmul.mubr.f32.gmra.mrb[30].mxu0 %v966_v63 }
 0x43a   :  { %1126 = vmatprep.mubr.f32.mxu0 %v2597_v20 }
 0x43d   :  { %1127 = vmatmul.mubr.f32.gmra.mrb[32].mxu0 %v967_v11 }
 0x43e   :  { %1132 = vmatprep.mubr.f32.mxu0 %v2597_v20 }
 0x441   :  { %1133 = vmatmul.mubr.f32.gmra.mrb[34].mxu0 %v968_v24 }
 0x442   :  { %1138 = vmatprep.mubr.f32.mxu0 %v2597_v20 }
 0x445   :  { %1139 = vmatmul.mubr.f32.gmra.mrb[36].mxu0 %v969_v0 }
 0x446   :  { %1144 = vmatprep.mubr.f32.mxu0 %v2597_v20 }
 0x449   :  { %1145 = vmatmul.mubr.f32.gmra.mrb[38].mxu0 %v970_v25 }
 0x44a   :  { %1150 = vmatprep.mubr.f32.mxu0 %v2597_v20 }
 0x44d   :  { %1151 = vmatmul.mubr.f32.gmra.mrb[40].mxu0 %v971_v5 }
 0x44e   :  { %1156 = vmatprep.mubr.f32.mxu0 %v2597_v20 }
 0x451   :  { %1157 = vmatmul.mubr.f32.gmra.mrb[42].mxu0 %v972_v36 }
 0x452   :  { %1162 = vmatprep.mubr.f32.mxu0 %v2597_v20 }
 0x455   :  { %1163 = vmatmul.mubr.f32.gmra.mrb[44].mxu0 %v973_v45 }
 0x456   :  { %1168 = vmatprep.mubr.f32.mxu0 %v2597_v20 }
 0x459   :  { %1169 = vmatmul.mubr.f32.gmra.mrb[46].mxu0 %v974_v6 }
 0x45a   :  { %1174 = vmatprep.mubr.f32.mxu0 %v2597_v20 }
 0x45d   :  { %1175 = vmatmul.mubr.f32.gmra.mrb[48].mxu0 %v975_v7 }
 0x4f4   :  { %v1086_v41 = vpop.f32.mrb[18].mxu0 }
 0x4f5   :  { %v1088_v38 = vpop.f32.mrb[19].mxu0  ;;  %v1087_v9 = vadd.f32 %v1086_v41, %v3152_v31 }
 0x4f6   :  { %v1089_v30 = vadd.f32 %v1088_v38, %v3149_v8 }
 0x4f7   :  { %v1213_v16 = vmul.f32 0.01, %v1087_v9  ;;  %vm1181_vm1 = vcmp.ge.f32.partialorder %v1087_v9, 0.0 }
 0x4f8   :  { %v1092_v59 = vpop.f32.mrb[20].mxu0  ;;  %v1214_v15 = vmul.f32 0.01, %v1089_v30  ;;  %vm1182_vm3 = vcmp.ge.f32.partialorder %v1089_v30, 0.0 }
 0x4f9   :  { %v1093_v12 = vadd.f32 %v1092_v59, %v3152_v31  ;;  %v1094_v14 = vpop.f32.mrb[21].mxu0  ;;  %v3165_v32 = vsel %vm1181_vm1, %v1087_v9, %v1213_v16 }
 0x4fa   :  { %v1095_v4 = vadd.f32 %v1094_v14, %v3149_v8  ;;  %v3160_v18 = vsel %vm1182_vm3, %v1089_v30, %v1214_v15 }
 0x4fb   :  { %vm1183_vm4 = vcmp.ge.f32.partialorder %v1093_v12, 0.0  ;;  %v1215_v1 = vmul.f32 0.01, %v1093_v12 }
 0x4fc   :  { %vm1184_vm5 = vcmp.ge.f32.partialorder %v1095_v4, 0.0  ;;  %v1216_v17 = vmul.f32 0.01, %v1095_v4  ;;  %v1098_v13 = vpop.f32.mrb[22].mxu0 }
 0x4fd   :  { %v3158_v10 = vsel %vm1183_vm4, %v1093_v12, %v1215_v1  ;;  %v1100_v22 = vpop.f32.mrb[23].mxu0  ;;  %v1099_v26 = vadd.f32 %v1098_v13, %v3152_v31 }
 0x4fe   :  { %v3162_v19 = vsel %vm1184_vm5, %v1095_v4, %v1216_v17  ;;  %v1101_v23 = vadd.f32 %v1100_v22, %v3149_v8  ;;  %v2403_v28 = vpack.c.bf16 %v3158_v10, %v3165_v32 }
 0x4ff   :  { %v2401_v27 = vpack.c.bf16 %v3162_v19, %v3160_v18  ;;  %v1217_v43 = vmul.f32 0.01, %v1099_v26  ;;  %vm1185_vm8 = vcmp.ge.f32.partialorder %v1099_v26, 0.0 }
 0x500   :  { %v1104_v29 = vpop.f32.mrb[24].mxu0  ;;  %v1218_v37 = vmul.f32 0.01, %v1101_v23  ;;  %vm1186_vm6 = vcmp.ge.f32.partialorder %v1101_v23, 0.0 }
 0x501   :  { %v1105_v34 = vadd.f32 %v1104_v29, %v3152_v31  ;;  %v1106_v35 = vpop.f32.mrb[25].mxu0  ;;  %2402 = vmatprep.subr.bf16.mxu1 %v2401_v27  ;;  %v3181_v51 = vsel %vm1185_vm8, %v1099_v26, %v1217_v43 }
 0x502   :  { %v1107_v42 = vadd.f32 %v1106_v35, %v3149_v8  ;;  %2404 = vmatpush1.bf16.msra.mxu1 %v2403_v28  ;;  %v3176_v39 = vsel %vm1186_vm6, %v1101_v23, %v1218_v37 }
 0x503   :  { %vm1187_vm7 = vcmp.ge.f32.partialorder %v1105_v34, 0.0  ;;  %v1219_v44 = vmul.f32 0.01, %v1105_v34 }
 0x504   :  { %vm1188_vm9 = vcmp.ge.f32.partialorder %v1107_v42, 0.0  ;;  %v1220_v46 = vmul.f32 0.01, %v1107_v42  ;;  %v1110_v48 = vpop.f32.mrb[26].mxu0 }
 0x505   :  { %v3174_v53 = vsel %vm1187_vm7, %v1105_v34, %v1219_v44  ;;  %v1112_v54 = vpop.f32.mrb[27].mxu0  ;;  %v1111_v33 = vadd.f32 %v1110_v48, %v3152_v31 }
 0x506   :  { %v3178_v21 = vsel %vm1188_vm9, %v1107_v42, %v1220_v46  ;;  %v1113_v58 = vadd.f32 %v1112_v54, %v3149_v8  ;;  %v2407_v3 = vpack.c.bf16 %v3174_v53, %v3181_v51 }
 0x507   :  { %v2405_v55 = vpack.c.bf16 %v3178_v21, %v3176_v39  ;;  %v1221_v11 = vmul.f32 0.01, %v1111_v33  ;;  %vm1189_vm12 = vcmp.ge.f32.partialorder %v1111_v33, 0.0 }
 0x508   :  { %v1116_v57 = vpop.f32.mrb[28].mxu0  ;;  %v1222_v62 = vmul.f32 0.01, %v1113_v58  ;;  %vm1190_vm10 = vcmp.ge.f32.partialorder %v1113_v58, 0.0 }
 0x509   :  { %v1117_v56 = vadd.f32 %v1116_v57, %v3152_v31  ;;  %v1118_v61 = vpop.f32.mrb[29].mxu0  ;;  %2406 = vmatprep.subr.bf16.mxu1 %v2405_v55  ;;  %v3197_v6 = vsel %vm1189_vm12, %v1111_v33, %v1221_v11 }
 0x50a   :  { %v1119_v63 = vadd.f32 %v1118_v61, %v3149_v8  ;;  %2408 = vmatpush1.bf16.msra.mxu1 %v2407_v3  ;;  %v3192_v45 = vsel %vm1190_vm10, %v1113_v58, %v1222_v62 }
 0x50b   :  { %vm1191_vm11 = vcmp.ge.f32.partialorder %v1117_v56, 0.0  ;;  %v1223_v24 = vmul.f32 0.01, %v1117_v56 }
 0x50c   :  { %vm1192_vm13 = vcmp.ge.f32.partialorder %v1119_v63, 0.0  ;;  %v1224_v0 = vmul.f32 0.01, %v1119_v63  ;;  %v1122_v25 = vpop.f32.mrb[30].mxu0 }
 0x50d   :  { %v3190_v5 = vsel %vm1191_vm11, %v1117_v56, %v1223_v24  ;;  %v1124_v36 = vpop.f32.mrb[31].mxu0  ;;  %v1123_v7 = vadd.f32 %v1122_v25, %v3152_v31 }
 0x50e   :  { %v3194_v2 = vsel %vm1192_vm13, %v1119_v63, %v1224_v0  ;;  %v1125_v60 = vadd.f32 %v1124_v36, %v3149_v8  ;;  %v2411_v41 = vpack.c.bf16 %v3190_v5, %v3197_v6 }
 0x50f   :  { %v2409_v47 = vpack.c.bf16 %v3194_v2, %v3192_v45  ;;  %v1225_v14 = vmul.f32 0.01, %v1123_v7  ;;  %vm1193_vm0 = vcmp.ge.f32.partialorder %v1123_v7, 0.0 }
 0x510   :  { %v1128_v38 = vpop.f32.mrb[32].mxu0  ;;  %v1226_v59 = vmul.f32 0.01, %v1125_v60  ;;  %vm1194_vm14 = vcmp.ge.f32.partialorder %v1125_v60, 0.0 }
 0x511   :  { %v1129_v30 = vadd.f32 %v1128_v38, %v3152_v31  ;;  %v1130_v9 = vpop.f32.mrb[33].mxu0  ;;  %2410 = vmatprep.subr.bf16.mxu1 %v2409_v47  ;;  %v3213_v26 = vsel %vm1193_vm0, %v1123_v7, %v1225_v14 }
 0x512   :  { %v1131_v12 = vadd.f32 %v1130_v9, %v3149_v8  ;;  %2412 = vmatpush1.bf16.msra.mxu1 %v2411_v41  ;;  %v3208_v13 = vsel %vm1194_vm14, %v1125_v60, %v1226_v59 }
 0x513   :  { %vm1195_vm15 = vcmp.ge.f32.partialorder %v1129_v30, 0.0  ;;  %v1227_v15 = vmul.f32 0.01, %v1129_v30 }
 0x514   :  { %vm1196_vm2 = vcmp.ge.f32.partialorder %v1131_v12, 0.0  ;;  %v1228_v4 = vmul.f32 0.01, %v1131_v12  ;;  %v1134_v16 = vpop.f32.mrb[34].mxu0 }
 0x515   :  { %v3206_v1 = vsel %vm1195_vm15, %v1129_v30, %v1227_v15  ;;  %v1136_v17 = vpop.f32.mrb[35].mxu0  ;;  %v1135_v27 = vadd.f32 %v1134_v16, %v3152_v31 }
 0x516   :  { %v3210_v22 = vsel %vm1196_vm2, %v1131_v12, %v1228_v4  ;;  %v1137_v23 = vadd.f32 %v1136_v17, %v3149_v8  ;;  %v2415_v29 = vpack.c.bf16 %v3206_v1, %v3213_v26 }
 0x517   :  { %v2413_v28 = vpack.c.bf16 %v3210_v22, %v3208_v13  ;;  %v1229_v44 = vmul.f32 0.01, %v1135_v27  ;;  %vm1197_vm1 = vcmp.ge.f32.partialorder %v1135_v27, 0.0 }
 0x518   :  { %v1140_v34 = vpop.f32.mrb[36].mxu0  ;;  %v1230_v42 = vmul.f32 0.01, %v1137_v23  ;;  %vm1198_vm3 = vcmp.ge.f32.partialorder %v1137_v23, 0.0 }
 0x519   :  { %v1141_v35 = vadd.f32 %v1140_v34, %v3152_v31  ;;  %v1142_v37 = vpop.f32.mrb[37].mxu0  ;;  %2414 = vmatprep.subr.bf16.mxu1 %v2413_v28  ;;  %v3229_v56 = vsel %vm1197_vm1, %v1135_v27, %v1229_v44 }
 0x51a   :  { %v1143_v43 = vadd.f32 %v1142_v37, %v3149_v8  ;;  %2416 = vmatpush1.bf16.msra.mxu1 %v2415_v29  ;;  %v3224_v55 = vsel %vm1198_vm3, %v1137_v23, %v1230_v42 }
 0x51b   :  { %vm1199_vm4 = vcmp.ge.f32.partialorder %v1141_v35, 0.0  ;;  %v1231_v46 = vmul.f32 0.01, %v1141_v35 }
 0x51c   :  { %vm1200_vm5 = vcmp.ge.f32.partialorder %v1143_v43, 0.0  ;;  %v1232_v48 = vmul.f32 0.01, %v1143_v43  ;;  %v1146_v54 = vpop.f32.mrb[38].mxu0 }
 0x51d   :  { %v3222_v58 = vsel %vm1199_vm4, %v1141_v35, %v1231_v46  ;;  %v1148_v33 = vpop.f32.mrb[39].mxu0  ;;  %v1147_v61 = vadd.f32 %v1146_v54, %v3152_v31 }
 0x51e   :  { %v3226_v3 = vsel %vm1200_vm5, %v1143_v43, %v1232_v48  ;;  %v1149_v57 = vadd.f32 %v1148_v33, %v3149_v8  ;;  %v2419_v63 = vpack.c.bf16 %v3222_v58, %v3229_v56 }
 0x51f   :  { %v2417_v62 = vpack.c.bf16 %v3226_v3, %v3224_v55  ;;  %v1233_v60 = vmul.f32 0.01, %v1147_v61  ;;  %vm1201_vm8 = vcmp.ge.f32.partialorder %v1147_v61, 0.0 }
 0x520   :  { %v1152_v11 = vpop.f32.mrb[40].mxu0  ;;  %v1234_v25 = vmul.f32 0.01, %v1149_v57  ;;  %vm1202_vm6 = vcmp.ge.f32.partialorder %v1149_v57, 0.0 }
 0x521   :  { %v1153_v24 = vadd.f32 %v1152_v11, %v3152_v31  ;;  %v1154_v0 = vpop.f32.mrb[41].mxu0  ;;  %2418 = vmatprep.subr.bf16.mxu1 %v2417_v62  ;;  %v3245_v14 = vsel %vm1201_vm8, %v1147_v61, %v1233_v60 }
 0x522   :  { %v1155_v36 = vadd.f32 %v1154_v0, %v3149_v8  ;;  %2420 = vmatpush1.bf16.msra.mxu1 %v2419_v63  ;;  %v3240_v9 = vsel %vm1202_vm6, %v1149_v57, %v1234_v25 }
 0x523   :  { %vm1203_vm7 = vcmp.ge.f32.partialorder %v1153_v24, 0.0  ;;  %v1235_v7 = vmul.f32 0.01, %v1153_v24 }
 0x524   :  { %vm1204_vm9 = vcmp.ge.f32.partialorder %v1155_v36, 0.0  ;;  %v1236_v47 = vmul.f32 0.01, %v1155_v36  ;;  %v1158_v41 = vpop.f32.mrb[42].mxu0 }
 0x525   :  { %v3238_v38 = vsel %vm1203_vm7, %v1153_v24, %v1235_v7  ;;  %v1160_v30 = vpop.f32.mrb[43].mxu0  ;;  %v1159_v15 = vadd.f32 %v1158_v41, %v3152_v31  ;;  %v1351_v41 = vmul.f32 %v3162_v19, %v3162_v19 }
 0x526   :  { %v3242_v59 = vsel %vm1204_vm9, %v1155_v36, %v1236_v47  ;;  %v1161_v12 = vadd.f32 %v1160_v30, %v3149_v8  ;;  %v2423_v16 = vpack.c.bf16 %v3238_v38, %v3245_v14 }
 0x527   :  { %v2421_v4 = vpack.c.bf16 %v3242_v59, %v3240_v9  ;;  %v1237_v34 = vmul.f32 0.01, %v1159_v15  ;;  %vm1205_vm12 = vcmp.ge.f32.partialorder %v1159_v15, 0.0 }
 0x528   :  { %v1164_v17 = vpop.f32.mrb[44].mxu0  ;;  %v1238_v28 = vmul.f32 0.01, %v1161_v12  ;;  %vm1206_vm10 = vcmp.ge.f32.partialorder %v1161_v12, 0.0 }
 0x529   :  { %v1165_v23 = vadd.f32 %v1164_v17, %v3152_v31  ;;  %v1166_v27 = vpop.f32.mrb[45].mxu0  ;;  %2422 = vmatprep.subr.bf16.mxu1 %v2421_v4  ;;  %v3261_v33 = vsel %vm1205_vm12, %v1159_v15, %v1237_v34  ;;  %v1349_v15 = vmul.f32 %v3160_v18, %v3160_v18  ;;  %v1350_v4 = vmul.f32 %v3158_v10, %v3158_v10 }
 0x52a   :  { %v1167_v29 = vadd.f32 %v1166_v27, %v3149_v8  ;;  %2424 = vmatpush1.bf16.msra.mxu1 %v2423_v16  ;;  %v3256_v46 = vsel %vm1206_vm10, %v1161_v12, %v1238_v28  ;;  %v1348_v27 = vmul.f32 %v3165_v32, %v3165_v32  ;;  %v1353_v28 = vmul.f32 %v3176_v39, %v3176_v39 }
 0x52b   :  { %vm1207_vm11 = vcmp.ge.f32.partialorder %v1165_v23, 0.0  ;;  %v1239_v35 = vmul.f32 0.01, %v1165_v23  ;;  %v2433_v17 = vpack.c.bf16 %v1351_v41, %v1349_v15  ;;  %v1371_v15 = vmul.f32 %v3242_v59, %v3242_v59 }
 0x52c   :  { %vm1208_vm13 = vcmp.ge.f32.partialorder %v1167_v29, 0.0  ;;  %v1240_v37 = vmul.f32 0.01, %v1167_v29  ;;  %v1170_v42 = vpop.f32.mrb[46].mxu0  ;;  %v2435_v34 = vpack.c.bf16 %v1350_v4, %v1348_v27  ;;  %v1364_v4 = vmul.f32 %v3229_v56, %v3229_v56 }
 0x52d   :  { %v3254_v43 = vsel %vm1207_vm11, %v1165_v23, %v1239_v35  ;;  %v1172_v44 = vpop.f32.mrb[47].mxu0  ;;  %v1171_v57 = vadd.f32 %v1170_v42, %v3152_v31  ;;  %v1355_v23 = vmul.f32 %v3178_v21, %v3178_v21  ;;  %v1352_v42 = vmul.f32 %v3181_v51, %v3181_v51 }
 0x52e   :  { %v3258_v48 = vsel %vm1208_vm13, %v1167_v29, %v1240_v37  ;;  %v1173_v54 = vadd.f32 %v1172_v44, %v3149_v8  ;;  %v2427_v62 = vpack.c.bf16 %v3254_v43, %v3261_v33  ;;  %v1354_v29 = vmul.f32 %v3174_v53, %v3174_v53 }
 0x52f   :  { %v2425_v61 = vpack.c.bf16 %v3258_v48, %v3256_v46  ;;  %v1241_v36 = vmul.f32 0.01, %v1171_v57  ;;  %vm1209_vm0 = vcmp.ge.f32.partialorder %v1171_v57, 0.0  ;;  %v2437_v35 = vpack.c.bf16 %v1355_v23, %v1353_v28 }
 0x530   :  { %v1176_v63 = vpop.f32.mrb[48].mxu0  ;;  %v1242_v0 = vmul.f32 0.01, %v1173_v54  ;;  %vm1210_vm14 = vcmp.ge.f32.partialorder %v1173_v54, 0.0  ;;  %v1359_v37 = vmul.f32 %v3194_v2, %v3194_v2  ;;  %v1357_v44 = vmul.f32 %v3192_v45, %v3192_v45 }
 0x531   :  { %v1177_v11 = vadd.f32 %v1176_v63, %v3152_v31  ;;  %v1178_v24 = vpop.f32.mrb[49].mxu0  ;;  %2426 = vmatprep.subr.bf16.mxu1 %v2425_v61  ;;  %v3278_v12 = vsel %vm1209_vm0, %v1171_v57, %v1241_v36  ;;  %v2439_v57 = vpack.c.bf16 %v1354_v29, %v1352_v42  ;;  %v1356_v63 = vmul.f32 %v3197_v6, %v3197_v6 }
 0x532   :  { %v1179_v25 = vadd.f32 %v1178_v24, %v3149_v8  ;;  %2428 = vmatpush1.bf16.msra.mxu1 %v2427_v62  ;;  %v3274_v30 = vsel %vm1210_vm14, %v1173_v54, %v1242_v0  ;;  %v1358_v54 = vmul.f32 %v3190_v5, %v3190_v5  ;;  %v2441_v61 = vpack.c.bf16 %v1359_v37, %v1357_v44 }
 0x533   :  { %vm1211_vm15 = vcmp.ge.f32.partialorder %v1177_v11, 0.0  ;;  %v1243_v60 = vmul.f32 0.01, %v1177_v11  ;;  %v1363_v62 = vmul.f32 %v3210_v22, %v3210_v22  ;;  %v1360_v36 = vmul.f32 %v3213_v26, %v3213_v26 }
 0x534   :  { %vm1212_vm2 = vcmp.ge.f32.partialorder %v1179_v25, 0.0  ;;  %v1244_v7 = vmul.f32 0.01, %v1179_v25  ;;  %v2443_v24 = vpack.c.bf16 %v1358_v54, %v1356_v63  ;;  %v1375_v28 = vmul.f32 %v3258_v48, %v3258_v48 }
 0x535   :  { %v3270_v47 = vsel %vm1211_vm15, %v1177_v11, %v1243_v60  ;;  %v1362_v11 = vmul.f32 %v3206_v1, %v3206_v1  ;;  %v1365_v60 = vmul.f32 %v3224_v55, %v3224_v55  ;;  %v1368_v29 = vmul.f32 %v3245_v14, %v3245_v14 }
 0x536   :  { %v3276_v31 = vsel %vm1212_vm2, %v1179_v25, %v1244_v7  ;;  %v2431_v16 = vpack.c.bf16 %v3270_v47, %v3278_v12  ;;  %v1367_v25 = vmul.f32 %v3226_v3, %v3226_v3  ;;  %v1366_v7 = vmul.f32 %v3222_v58, %v3222_v58 }
 0x537   :  { %v2429_v8 = vpack.c.bf16 %v3276_v31, %v3274_v30  ;;  %v2447_v41 = vpack.c.bf16 %v1362_v11, %v1360_v36  ;;  %v1379_v44 = vmul.f32 %v3276_v31, %v3276_v31  ;;  %v1372_v54 = vmul.f32 %v3261_v33, %v3261_v33 }
 0x538   :  { %v2451_v23 = vpack.c.bf16 %v1366_v7, %v1364_v4  ;;  %v1596_v7 = vld [vmem:[#allocation5 + $0x90] sm:$0xff] }
 0x539   :  { %2430 = vmatprep.subr.bf16.mxu1 %v2429_v8  ;;  %v2449_v8 = vpack.c.bf16 %v1367_v25, %v1365_v60  ;;  %v1578_v25 = vld [vmem:[#allocation5] sm:$0xff]  ;;  %v1579_v60 = vld [vmem:[#allocation5 + $0x8] sm:$0xff]  ;;  %v1580_v4 = vld [vmem:[#allocation5 + $0x10] sm:$0xff] }
 0x53a   :  { %2432 = vmatpush1.bf16.msra.mxu1 %v2431_v16  ;;  %v1369_v16 = vmul.f32 %v3240_v9, %v3240_v9 }
 0x53b   :  { %2434 = vmatprep.subr.bf16.mxu1 %v2433_v17  ;;  %v1370_v17 = vmul.f32 %v3238_v38, %v3238_v38 }
 0x53c   :  { %v2453_v27 = vpack.c.bf16 %v1371_v15, %v1369_v16  ;;  %v1581_v16 = vld [vmem:[#allocation5 + $0x18] sm:$0xff] }
 0x53d   :  { %1342 = vmatmul.mubr.f32.vlgmr.msra.gmra.mrb[22].mxu1 %v2598_v40  ;;  %v2455_v37 = vpack.c.bf16 %v1370_v17, %v1368_v29  ;;  %v1598_v17 = vld [vmem:[#allocation5 + $0xa0] sm:$0xff] }
 0x53e   :  { %2436 = vmatpush1.bf16.msra.mxu1 %v2435_v34  ;;  %1444 = vmatprep.mubr.f32.mxu1 %v2597_v20  ;;  %v1361_v20 = vmul.f32 %v3208_v13, %v3208_v13  ;;  %v1373_v34 = vmul.f32 %v3256_v46, %v3256_v46  ;;  %v1582_v29 = vld [vmem:[#allocation5 + $0x20] sm:$0xff] }
 0x53f   :  { %2438 = vmatprep.subr.bf16.mxu1 %v2437_v35  ;;  %v1374_v35 = vmul.f32 %v3254_v43, %v3254_v43 }
 0x540   :  { %v2445_v0 = vpack.c.bf16 %v1363_v62, %v1361_v20  ;;  %v2457_v42 = vpack.c.bf16 %v1375_v28, %v1373_v34  ;;  %v1376_v20 = vmul.f32 %v3278_v12, %v3278_v12  ;;  %v1600_v34 = vld [vmem:[#allocation5 + $0xb0] sm:$0xff] }
 0x541   :  { %v2459_v62 = vpack.c.bf16 %v1374_v35, %v1372_v54  ;;  %v1601_v35 = vld [vmem:[#allocation5 + $0xb8] sm:$0xff] }
 0x542   :  { %2440 = vmatpush1.bf16.msra.mxu1 %v2439_v57  ;;  %v1377_v57 = vmul.f32 %v3274_v30, %v3274_v30  ;;  %v1585_v54 = vld [vmem:[#allocation5 + $0x38] sm:$0xff] }
 0x543   :  { %2442 = vmatprep.subr.bf16.mxu1 %v2441_v61  ;;  %v1378_v61 = vmul.f32 %v3270_v47, %v3270_v47 }
 0x544   :  { %v2461_v63 = vpack.c.bf16 %v1379_v44, %v1377_v57  ;;  %v1584_v44 = vld [vmem:[#allocation5 + $0x30] sm:$0xff] }
 0x545   :  { %v2463_v11 = vpack.c.bf16 %v1378_v61, %v1376_v20  ;;  %v2479_v57 = vpack.c.bf16 %v1585_v54, %v1584_v44  ;;  %v1602_v61 = vld [vmem:[#allocation5 + $0xc0] sm:$0xff] }
 0x546   :  { %2444 = vmatpush1.bf16.msra.mxu1 %v2443_v24  ;;  %v1594_v24 = vld [vmem:[#allocation5 + $0x80] sm:$0xff] }
 0x547   :  { %2446 = vmatprep.subr.bf16.mxu1 %v2445_v0  ;;  %v1595_v0 = vld [vmem:[#allocation5 + $0x88] sm:$0xff]  ;;  %v1586_v20 = vld [vmem:[#allocation5 + $0x40] sm:$0xff] }
 0x548   :  { %v2465_v36 = vpack.c.bf16 %v1595_v0, %v1594_v24  ;;  %v1604_v0 = vld [vmem:[#allocation5 + $0xd0] sm:$0xff] }
 0x54a   :  { %2448 = vmatpush1.bf16.msra.mxu1 %v2447_v41  ;;  %v1597_v41 = vld [vmem:[#allocation5 + $0x98] sm:$0xff]  ;;  %2466 = vmatprep.subr.bf16.mxu0 %v2465_v36 }
 0x54b   :  { %2450 = vmatprep.subr.bf16.mxu1 %v2449_v8  ;;  %v2467_v8 = vpack.c.bf16 %v1579_v60, %v1578_v25  ;;  %v2469_v15 = vpack.c.bf16 %v1597_v41, %v1596_v7  ;;  %v1605_v25 = vld [vmem:[#allocation5 + $0xd8] sm:$0xff]  ;;  %v1588_v60 = vld [vmem:[#allocation5 + $0x50] sm:$0xff] }
 0x54c   :  { %v2485_v36 = vpack.c.bf16 %v1605_v25, %v1604_v0  ;;  %v1589_v7 = vld [vmem:[#allocation5 + $0x58] sm:$0xff]  ;;  %v2599_v0 = vmov 1966171168  }
 0x54d   :  { %2468 = vmatpush3.bf16.msra.mxu0 %v2467_v8  ;;  %v2487_v41 = vpack.c.bf16 %v1589_v7, %v1588_v60  ;;  %v1606_v8 = vld [vmem:[#allocation5 + $0xe0] sm:$0xff]  ;;  %v1480_v25 = vunpack.c.l.s4 %v2599_v0 }
 0x54e   :  { %2452 = vmatpush1.bf16.msra.mxu1 %v2451_v23  ;;  %v1599_v23 = vld [vmem:[#allocation5 + $0xa8] sm:$0xff]  ;;  %2470 = vmatprep.subr.bf16.mxu0 %v2469_v15 }
 0x54f   :  { %2454 = vmatprep.subr.bf16.mxu1 %v2453_v27  ;;  %v2471_v27 = vpack.c.bf16 %v1581_v16, %v1580_v4  ;;  %v2473_v28 = vpack.c.bf16 %v1599_v23, %v1598_v17  ;;  %v1607_v15 = vld [vmem:[#allocation5 + $0xe8] sm:$0xff]  ;;  %v1590_v4 = vld [vmem:[#allocation5 + $0x60] sm:$0xff]  ;;  %v1608_v23 = vld [vmem:[#allocation5 + $0xf0] sm:$0xff] }
 0x550   :  { %v2489_v16 = vpack.c.bf16 %v1607_v15, %v1606_v8  ;;  %v1591_v17 = vld [vmem:[#allocation5 + $0x68] sm:$0xff] }
 0x551   :  { %2472 = vmatpush3.bf16.msra.mxu0 %v2471_v27  ;;  %v1609_v27 = vld [vmem:[#allocation5 + $0xf8] sm:$0xff] }
 0x552   :  { %2456 = vmatpush1.bf16.msra.mxu1 %v2455_v37  ;;  %2474 = vmatprep.subr.bf16.mxu0 %v2473_v28  ;;  %v2491_v28 = vpack.c.bf16 %v1591_v17, %v1590_v4 }
 0x553   :  { %2458 = vmatprep.subr.bf16.mxu1 %v2457_v42  ;;  %v2477_v42 = vpack.c.bf16 %v1601_v35, %v1600_v34  ;;  %v1593_v34 = vld [vmem:[#allocation5 + $0x78] sm:$0xff] }
 0x556   :  { %2460 = vmatpush1.bf16.msra.mxu1 %v2459_v62  ;;  %v1603_v62 = vld [vmem:[#allocation5 + $0xc8] sm:$0xff] }
 0x557   :  { %2462 = vmatprep.subr.bf16.mxu1 %v2461_v63  ;;  %v2481_v63 = vpack.c.bf16 %v1603_v62, %v1602_v61 }
 0x55a   :  { %2464 = vmatpush1.bf16.msra.mxu1 %v2463_v11  ;;  %v1587_v11 = vld [vmem:[#allocation5 + $0x48] sm:$0xff] }
 0x55b   :  { %v2483_v24 = vpack.c.bf16 %v1587_v11, %v1586_v20 }
 0x55d   :  { %1445 = vmatmul.mubr.f32.vlgmr.msra.gmra.mrb[24].mxu1 %v2598_v40  ;;  %v1583_v40 = vld [vmem:[#allocation5 + $0x28] sm:$0xff] }
 0x55e   :  { %v2475_v37 = vpack.c.bf16 %v1583_v40, %v1582_v29  ;;  %v2493_v29 = vpack.c.bf16 %v1609_v27, %v1608_v23  ;;  %v1592_v40 = vld [vmem:[#allocation5 + $0x70] sm:$0xff] }
 0x55f   :  { %v2495_v35 = vpack.c.bf16 %v1593_v34, %v1592_v40 }
 0x560   :  { %2476 = vmatpush3.bf16.msra.mxu0 %v2475_v37 }
 0x561   :  { %2478 = vmatprep.subr.bf16.mxu0 %v2477_v42 }
 0x564   :  { %2480 = vmatpush3.bf16.msra.mxu0 %v2479_v57 }
 0x565   :  { %2482 = vmatprep.subr.bf16.mxu0 %v2481_v63 }
 0x568   :  { %2484 = vmatpush3.bf16.msra.mxu0 %v2483_v24  ;;  %v1459_v24 = vld [vmem:[%s3441_s11] sm:$0x3] }
 0x569   :  { %2486 = vmatprep.subr.bf16.mxu0 %v2485_v36  ;;  %v1464_v36 = vrot.slane %v1459_v24, %v2959_v52  ;;  %v1468_v60 = vrot.slane %v1459_v24, %v3143_v50 }
 0x56c   :  { %2488 = vmatpush3.bf16.msra.mxu0 %v2487_v41  ;;  %v1481_v41 = vunpack.c.0.s8 %v1480_v25 }
 0x56d   :  { %2490 = vmatprep.subr.bf16.mxu0 %v2489_v16 }
 0x56e   :  { %v1484_v27 = vsub.s32 %v1481_v41, %v2953_v49 }
 0x570   :  { %2492 = vmatpush3.bf16.msra.mxu0 %v2491_v28 }
 0x571   :  { %2494 = vmatprep.subr.bf16.mxu0 %v2493_v29 }
 0x574   :  { %2496 = vmatpush3.bf16.msra.mxu0 %v2495_v35 }
 0x610   :  { %v1343_v37 = vpop.f32.mrb[22].mxu1 }
 0x611   :  { %v1345_v42 = vpop.f32.mrb[23].mxu1  ;;  %v1451_v44 = vmul.f32 %v1343_v37, %v1343_v37 }
 0x612   :  { %v1452_v54 = vmul.f32 %v1345_v42, %v1345_v42 }
 0x630   :  { %v1446_v57 = vpop.f32.mrb[24].mxu1 }
 0x631   :  { %v1453_v61 = vsub.f32 %v1446_v57, %v1451_v44  ;;  %v1448_v62 = vpop.f32.mrb[25].mxu1 }
 0x632   :  { %v1454_v63 = vsub.f32 %v1448_v62, %v1452_v54 }
 0x633   :  { %v1455_v20 = vadd.f32 1e-05, %v1453_v61  ;;  %v1473_v61 = vld [vmem:[%s3442_s12] sm:$0x3] }
 0x634   :  { %v1456_v11 = vadd.f32 1e-05, %v1454_v63 }
 0x635   :  { %2513 = vrsqrt.f32 %v1455_v20 }
 0x636   :  { %2515 = vrsqrt.f32 %v1456_v11 }
 0x63f   :  { %v2514_v7 = vpop.eup %2513 }
 0x640   :  { %v2516_v8 = vpop.eup %2515  ;;  %v1471_v15 = vmul.f32 %v2514_v7, %v1464_v36 }
 0x641   :  { %v1472_v4 = vmul.f32 %v2516_v8, %v1468_v60 }
 0x642   :  { %v1474_v16 = vmul.f32 %v1471_v15, %v1343_v37  ;;  %v1498_v17 = vrot.slane %v1471_v15, %v2959_v52 }
 0x643   :  { %v1475_v23 = vmul.f32 %v1472_v4, %v1345_v42  ;;  %v1502_v28 = vrot.slane %v1472_v4, %v2959_v52 }
 0x644   :  { %v1503_v40 = vmul.f32 %v1498_v17, %v3165_v32  ;;  %v1505_v35 = vmul.f32 %v1498_v17, %v3158_v10  ;;  %v1507_v44 = vmul.f32 %v1498_v17, %v3181_v51  ;;  %v1509_v54 = vmul.f32 %v1498_v17, %v3174_v53 }
 0x645   :  { %v1478_v29 = vcombine.low %v1474_v16, %v1475_v23  ;;  %v1504_v34 = vmul.f32 %v1502_v28, %v3160_v18  ;;  %v1506_v37 = vmul.f32 %v1502_v28, %v3162_v19  ;;  %v1508_v42 = vmul.f32 %v1502_v28, %v3176_v39 }
 0x646   :  { %v1510_v49 = vmul.f32 %v1502_v28, %v3178_v21  ;;  %v1512_v32 = vmul.f32 %v1502_v28, %v3192_v45  ;;  %v1511_v18 = vmul.f32 %v1498_v17, %v3197_v6  ;;  %v1514_v10 = vmul.f32 %v1502_v28, %v3194_v2 }
 0x647   :  { %v1485_v57 = vrot.slane %v1478_v29, %v1484_v27  ;;  %v1513_v51 = vmul.f32 %v1498_v17, %v3190_v5  ;;  %v1516_v62 = vmul.f32 %v1502_v28, %v3208_v13  ;;  %v1515_v19 = vmul.f32 %v1498_v17, %v3213_v26 }
 0x648   :  { %v1518_v39 = vmul.f32 %v1502_v28, %v3210_v22  ;;  %v1517_v21 = vmul.f32 %v1498_v17, %v3206_v1  ;;  %v1520_v63 = vmul.f32 %v1502_v28, %v3224_v55  ;;  %v1519_v20 = vmul.f32 %v1498_v17, %v3229_v56 }
 0x649   :  { %v1492_v53 = vrot.slane %v1485_v57, %v1484_v27  ;;  %v1522_v45 = vmul.f32 %v1502_v28, %v3226_v3  ;;  %v1521_v2 = vmul.f32 %v1498_v17, %v3222_v58  ;;  %v1524_v5 = vmul.f32 %v1502_v28, %v3240_v9 }
 0x64a   :  { %v1523_v11 = vmul.f32 %v1498_v17, %v3245_v14  ;;  %v1526_v13 = vmul.f32 %v1502_v28, %v3242_v59  ;;  %v1525_v26 = vmul.f32 %v1498_v17, %v3238_v38  ;;  %v1528_v22 = vmul.f32 %v1502_v28, %v3256_v46 }
 0x64b   :  { %v1494_v6 = vsub.f32 %v1473_v61, %v1492_v53  ;;  %v1527_v1 = vmul.f32 %v1498_v17, %v3261_v33  ;;  %v1530_v3 = vmul.f32 %v1502_v28, %v3258_v48  ;;  %v1529_v58 = vmul.f32 %v1498_v17, %v3254_v43 }
 0x64c   :  { %v1532_v9 = vmul.f32 %v1502_v28, %v3274_v30  ;;  %v1531_v14 = vmul.f32 %v1498_v17, %v3278_v12  ;;  %v1534_v59 = vmul.f32 %v1502_v28, %v3276_v31  ;;  %v1533_v38 = vmul.f32 %v1498_v17, %v3270_v47 }
 0x64d   :  { %v1539_v55 = vrot.slane %v1494_v6, %v2959_v52  ;;  %v1543_v56 = vrot.slane %v1494_v6, %v3143_v50 }
 0x64f   :  { %v1547_v24 = vadd.f32 %v1543_v56, %v1504_v34  ;;  %v1546_v46 = vadd.f32 %v1539_v55, %v1503_v40  ;;  %v1549_v0 = vadd.f32 %v1543_v56, %v1506_v37  ;;  %v1548_v33 = vadd.f32 %v1539_v55, %v1505_v35 }
 0x650   :  { %v1551_v25 = vadd.f32 %v1543_v56, %v1508_v42  ;;  %v1550_v52 = vadd.f32 %v1539_v55, %v1507_v44  ;;  %v1553_v36 = vadd.f32 %v1543_v56, %v1510_v49  ;;  %v1552_v50 = vadd.f32 %v1539_v55, %v1509_v54  ;;  %v3397_v42 = vld [vmem:[%s3444_s14] ss:$0 sm:$0xff]  ;;  %s2600_s14 = smov [#allocation7]  }
 0x651   :  { %1681 = vmatprep.mubr.f32.mxu0 %v1547_v24  ;;  %v1555_v48 = vadd.f32 %v1543_v56, %v1512_v32  ;;  %v1554_v60 = vadd.f32 %v1539_v55, %v1511_v18  ;;  %v1557_v43 = vadd.f32 %v1543_v56, %v1514_v10  ;;  %v1556_v7 = vadd.f32 %v1539_v55, %v1513_v51  ;;  %s1783_s24 = sshll.u32 %s2600_s14, 4  ;;  %s1784_s24 = int_to_ptr.vmem [resolvable:$true] %s1783_s24 }
 0x652   :  { %1682 = vmatmul.mubr.f32.vlgmr.msra.gmra.mrb[50].mxu0 %v1546_v46  ;;  %v1559_v30 = vadd.f32 %v1543_v56, %v1516_v62  ;;  %v1558_v12 = vadd.f32 %v1539_v55, %v1515_v19  ;;  %v1561_v41 = vadd.f32 %v1543_v56, %v1518_v39  ;;  %v1560_v31 = vadd.f32 %v1539_v55, %v1517_v21  ;;  %s2561_s1 = scalar_lea.vmem %s1784_s24, 2048  ;;  %p2566_p3 = scmp.lt.s32.totalorder %s1784_s24, %s1784_s24 }
 0x653   :  { %1686 = vmatprep.mubr.f32.mxu0 %v1549_v0  ;;  %v1563_v47 = vadd.f32 %v1543_v56, %v1520_v63  ;;  %v1562_v8 = vadd.f32 %v1539_v55, %v1519_v20  ;;  %v1565_v15 = vadd.f32 %v1543_v56, %v1522_v45  ;;  %v1564_v4 = vadd.f32 %v1539_v55, %v1521_v2  ;;  %p2562_p2 = scmp.ne.s32.totalorder %s1784_s24, %s2561_s1  ;;  %p2567_p4 = scmp.lt.s32.totalorder %s2561_s1, %s2561_s1 }
 0x654   :  { %v1567_v16 = vadd.f32 %v1543_v56, %v1524_v5  ;;  %v1566_v17 = vadd.f32 %v1539_v55, %v1523_v11  ;;  %v1569_v23 = vadd.f32 %v1543_v56, %v1526_v13  ;;  %v1568_v27 = vadd.f32 %v1539_v55, %v1525_v26 }
 0x655   :  { %v1571_v28 = vadd.f32 %v1543_v56, %v1528_v22  ;;  %v1570_v29 = vadd.f32 %v1539_v55, %v1527_v1  ;;  %v1573_v40 = vadd.f32 %v1543_v56, %v1530_v3  ;;  %v1572_v34 = vadd.f32 %v1539_v55, %v1529_v58  ;;  %p2568_p5 = por %p2567_p4, %p2566_p3 }
 0x656   :  { %1687 = vmatmul.mubr.f32.gmra.mrb[52].mxu0 %v1548_v33  ;;  %v1575_v35 = vadd.f32 %v1543_v56, %v1532_v9  ;;  %v1574_v44 = vadd.f32 %v1539_v55, %v1531_v14  ;;  %v1577_v54 = vadd.f32 %v1543_v56, %v1534_v59  ;;  %v1576_v57 = vadd.f32 %v1539_v55, %v1533_v38 }
 0x657   :  { %1691 = vmatprep.mubr.f32.mxu0 %v1551_v25  ;;  %p2569_p6 = pnand %p2568_p5, %p2562_p2 }
 0x65a   :  { %1692 = vmatmul.mubr.f32.gmra.mrb[54].mxu0 %v1550_v52 }
 0x65b   :  { %1696 = vmatprep.mubr.f32.mxu0 %v1553_v36 }
 0x65e   :  { %1697 = vmatmul.mubr.f32.gmra.mrb[56].mxu0 %v1552_v50 }
 0x65f   :  { %1701 = vmatprep.mubr.f32.mxu0 %v1555_v48 }
 0x662   :  { %1702 = vmatmul.mubr.f32.gmra.mrb[58].mxu0 %v1554_v60 }
 0x663   :  { %1706 = vmatprep.mubr.f32.mxu0 %v1557_v43 }
 0x666   :  { %1707 = vmatmul.mubr.f32.gmra.mrb[60].mxu0 %v1556_v7 }
 0x667   :  { %1711 = vmatprep.mubr.f32.mxu0 %v1559_v30 }
 0x66a   :  { %1712 = vmatmul.mubr.f32.gmra.mrb[62].mxu0 %v1558_v12 }
 0x66b   :  { %1716 = vmatprep.mubr.f32.mxu0 %v1561_v41 }
 0x66e   :  { %1717 = vmatmul.mubr.f32.gmra.mrb[64].mxu0 %v1560_v31 }
 0x66f   :  { %1721 = vmatprep.mubr.f32.mxu0 %v1563_v47 }
 0x672   :  { %1722 = vmatmul.mubr.f32.gmra.mrb[66].mxu0 %v1562_v8 }
 0x673   :  { %1726 = vmatprep.mubr.f32.mxu0 %v1565_v15 }
 0x676   :  { %1727 = vmatmul.mubr.f32.gmra.mrb[68].mxu0 %v1564_v4 }
 0x677   :  { %1731 = vmatprep.mubr.f32.mxu0 %v1567_v16 }
 0x67a   :  { %1732 = vmatmul.mubr.f32.gmra.mrb[70].mxu0 %v1566_v17 }
 0x67b   :  { %1736 = vmatprep.mubr.f32.mxu0 %v1569_v23 }
 0x67e   :  { %1737 = vmatmul.mubr.f32.gmra.mrb[72].mxu0 %v1568_v27 }
 0x67f   :  { %1741 = vmatprep.mubr.f32.mxu0 %v1571_v28 }
 0x682   :  { %1742 = vmatmul.mubr.f32.gmra.mrb[74].mxu0 %v1570_v29 }
 0x683   :  { %1746 = vmatprep.mubr.f32.mxu0 %v1573_v40 }
 0x686   :  { %1747 = vmatmul.mubr.f32.gmra.mrb[76].mxu0 %v1572_v34 }
 0x687   :  { %1751 = vmatprep.mubr.f32.mxu0 %v1575_v35 }
 0x68a   :  { %1752 = vmatmul.mubr.f32.gmra.mrb[78].mxu0 %v1574_v44 }
 0x68b   :  { %1756 = vmatprep.mubr.f32.mxu0 %v1577_v54 }
 0x68e   :  { %1757 = vmatmul.mubr.f32.gmra.mrb[80].mxu0 %v1576_v57 }
 0x725   :  { %v1965_v37 = vpop.f32.mrb[50].mxu0 }
 0x726   :  { %v1966_v49 = vpop.f32.mrb[51].mxu0 }
 0x727   :  { %v1967_v61 = vadd.f32 %v1966_v49, %v1965_v37 }
 0x729   :  { %v1684_v32 = vadd.f32 %v1967_v61, %v3397_v42  ;;  %v1968_v18 = vpop.f32.mrb[52].mxu0 }
 0x72a   :  { %v1969_v10 = vpop.f32.mrb[53].mxu0 }
 0x72b   :  { %1762 = vst [vmem:[#allocation7] sm:$0xff] %v1684_v32  ;;  %v1970_v51 = vadd.f32 %v1969_v10, %v1968_v18 }
 0x72d   :  { %v1689_v53 = vadd.f32 %v1970_v51, %v3397_v42  ;;  %v1971_v62 = vpop.f32.mrb[54].mxu0 }
 0x72e   :  { %v1972_v19 = vpop.f32.mrb[55].mxu0 }
 0x72f   :  { %1763 = vst [vmem:[#allocation7 + $0x8] sm:$0xff] %v1689_v53  ;;  %v1973_v39 = vadd.f32 %v1972_v19, %v1971_v62 }
 0x731   :  { %v1694_v21 = vadd.f32 %v1973_v39, %v3397_v42  ;;  %v1974_v63 = vpop.f32.mrb[56].mxu0 }
 0x732   :  { %v1975_v20 = vpop.f32.mrb[57].mxu0 }
 0x733   :  { %1764 = vst [vmem:[#allocation7 + $0x10] sm:$0xff] %v1694_v21  ;;  %v1976_v45 = vadd.f32 %v1975_v20, %v1974_v63 }
 0x735   :  { %v1699_v6 = vadd.f32 %v1976_v45, %v3397_v42  ;;  %v1977_v2 = vpop.f32.mrb[58].mxu0 }
 0x736   :  { %v1978_v5 = vpop.f32.mrb[59].mxu0 }
 0x737   :  { %1765 = vst [vmem:[#allocation7 + $0x18] sm:$0xff] %v1699_v6  ;;  %v1979_v11 = vadd.f32 %v1978_v5, %v1977_v2 }
 0x739   :  { %v1704_v13 = vadd.f32 %v1979_v11, %v3397_v42  ;;  %v1980_v26 = vpop.f32.mrb[60].mxu0 }
 0x73a   :  { %v1981_v22 = vpop.f32.mrb[61].mxu0 }
 0x73b   :  { %1766 = vst [vmem:[#allocation7 + $0x20] sm:$0xff] %v1704_v13  ;;  %v1982_v1 = vadd.f32 %v1981_v22, %v1980_v26 }
 0x73d   :  { %v1709_v55 = vadd.f32 %v1982_v1, %v3397_v42  ;;  %v1983_v56 = vpop.f32.mrb[62].mxu0 }
 0x73e   :  { %v1984_v3 = vpop.f32.mrb[63].mxu0 }
 0x73f   :  { %1767 = vst [vmem:[#allocation7 + $0x28] sm:$0xff] %v1709_v55  ;;  %v1985_v58 = vadd.f32 %v1984_v3, %v1983_v56 }
 0x741   :  { %v1714_v9 = vadd.f32 %v1985_v58, %v3397_v42  ;;  %v1986_v14 = vpop.f32.mrb[64].mxu0 }
 0x742   :  { %v1987_v59 = vpop.f32.mrb[65].mxu0 }
 0x743   :  { %1768 = vst [vmem:[#allocation7 + $0x30] sm:$0xff] %v1714_v9  ;;  %v1988_v38 = vadd.f32 %v1987_v59, %v1986_v14 }
 0x745   :  { %v1719_v24 = vadd.f32 %v1988_v38, %v3397_v42  ;;  %v1989_v46 = vpop.f32.mrb[66].mxu0 }
 0x746   :  { %v1990_v0 = vpop.f32.mrb[67].mxu0 }
 0x747   :  { %1769 = vst [vmem:[#allocation7 + $0x38] sm:$0xff] %v1719_v24  ;;  %v1991_v33 = vadd.f32 %v1990_v0, %v1989_v46 }
 0x749   :  { %v1724_v25 = vadd.f32 %v1991_v33, %v3397_v42  ;;  %v1992_v52 = vpop.f32.mrb[68].mxu0 }
 0x74a   :  { %v1993_v36 = vpop.f32.mrb[69].mxu0 }
 0x74b   :  { %1770 = vst [vmem:[#allocation7 + $0x40] sm:$0xff] %v1724_v25  ;;  %v1994_v50 = vadd.f32 %v1993_v36, %v1992_v52 }
 0x74d   :  { %v1729_v48 = vadd.f32 %v1994_v50, %v3397_v42  ;;  %v1995_v60 = vpop.f32.mrb[70].mxu0 }
 0x74e   :  { %v1996_v43 = vpop.f32.mrb[71].mxu0 }
 0x74f   :  { %1771 = vst [vmem:[#allocation7 + $0x48] sm:$0xff] %v1729_v48  ;;  %v1997_v7 = vadd.f32 %v1996_v43, %v1995_v60 }
 0x751   :  { %v1734_v30 = vadd.f32 %v1997_v7, %v3397_v42  ;;  %v1998_v12 = vpop.f32.mrb[72].mxu0 }
 0x752   :  { %v1999_v41 = vpop.f32.mrb[73].mxu0 }
 0x753   :  { %1772 = vst [vmem:[#allocation7 + $0x50] sm:$0xff] %v1734_v30  ;;  %v2000_v31 = vadd.f32 %v1999_v41, %v1998_v12 }
 0x755   :  { %v1739_v47 = vadd.f32 %v2000_v31, %v3397_v42  ;;  %v2001_v8 = vpop.f32.mrb[74].mxu0 }
 0x756   :  { %v2002_v15 = vpop.f32.mrb[75].mxu0 }
 0x757   :  { %1773 = vst [vmem:[#allocation7 + $0x58] sm:$0xff] %v1739_v47  ;;  %v2003_v4 = vadd.f32 %v2002_v15, %v2001_v8 }
 0x759   :  { %v1744_v16 = vadd.f32 %v2003_v4, %v3397_v42  ;;  %v2004_v17 = vpop.f32.mrb[76].mxu0 }
 0x75a   :  { %v2005_v23 = vpop.f32.mrb[77].mxu0 }
 0x75b   :  { %1774 = vst [vmem:[#allocation7 + $0x60] sm:$0xff] %v1744_v16  ;;  %v2006_v27 = vadd.f32 %v2005_v23, %v2004_v17 }
 0x75d   :  { %v1749_v28 = vadd.f32 %v2006_v27, %v3397_v42  ;;  %v2007_v29 = vpop.f32.mrb[78].mxu0 }
 0x75e   :  { %v2008_v40 = vpop.f32.mrb[79].mxu0 }
 0x75f   :  { %1775 = vst [vmem:[#allocation7 + $0x68] sm:$0xff] %v1749_v28  ;;  %v2009_v34 = vadd.f32 %v2008_v40, %v2007_v29 }
 0x761   :  { %v1754_v35 = vadd.f32 %v2009_v34, %v3397_v42  ;;  %v2010_v44 = vpop.f32.mrb[80].mxu0 }
 0x762   :  { %v2011_v54 = vpop.f32.mrb[81].mxu0 }
 0x763   :  { %1776 = vst [vmem:[#allocation7 + $0x70] sm:$0xff] %v1754_v35  ;;  %v2012_v57 = vadd.f32 %v2011_v54, %v2010_v44 }
 0x765   :  { %v1759_v37 = vadd.f32 %v2012_v57, %v3397_v42 }
 0x767   :  { %1777 = vst [vmem:[#allocation7 + $0x78] sm:$0xff] %v1759_v37 }
 0x768   :  { %2572 = shalt.err (!%p2569_p6)
}
 0x769   :  { %s2573_s27 = scalar_lea.hbm %s3445_s15, 2048 }
 0x76a   :  { %p2574_p7 = scmp.ne.s32.totalorder %s3445_s15, %s2573_s27  ;;  %p2577_p8 = scmp.lt.u32.totalorder %s2573_s27, %s3445_s15 }
 0x76c   :  { %p2579_p9 = pnand %p2577_p8, %p2574_p7 }
 0x76e   :  { %2582 = shalt.err (!%p2579_p9)
}
 0x76f   :  { %1789 = dma.vmem_to_hbm [thread:$0]  %s1784_s24, 2048, %s3445_s15, [#allocation4], %s2593_s9, %s2593_s9, %s2594_s19  }
 0x770   :  { %2587 = dma.done.wait [#allocation4], 2048  }
 0x771   :  { %2588 = vsyncadd [#allocation4], 4294965248 }
 0x772   :  { %1793 = vsyncpa [#allocation3], 1 }
 0x773   :  { %1794 = vsyncpa [#allocation6], 1 }
 0x774   :  { %1795 = vsyncpa [#allocation4], 1 }

</bundles_post_ra>
